<compile_context>
chip_gen: v6e
topology: v6e:2x2x1
jax: 0.10.0
libtpu: 0.0.40
codegen_flags: <defaults>
</compile_context>

<pallas_src>
import functools

import jax
import jax.numpy as jnp
import numpy as np
from jax.experimental import pallas as pl
from jax.experimental.pallas import tpu as pltpu

BN_EPS = 1e-5


# ---------------------------------------------------------------------------
# Fused block kernel
# ---------------------------------------------------------------------------
def _block_kernel(*args, stride, hr, Wo, Hp_s, Wp_s, planes, rows_par, w_dtype,
                  shortcut):
    """One grid step = one (batch element, strip of `hr` output rows).

    Stages (all intermediates stay in VMEM):
      1. expand 1x1 conv (+folded BN1 +ReLU) into the h1 scratch, per spatial parity
      2. depthwise 3x3 (+folded BN2 +ReLU), stride folded into the tap offsets
      3. project 1x1 (+folded BN3) + fused shortcut / residual add, write output strip
    """
    x_ref, m_ref, w1_ref, b1_ref, w2_ref, b2_ref, w3_ref, b3_ref = args[:8]
    rest = args[8:]
    if shortcut == "conv":
        ws_ref, bs_ref, xsc_ref, o_ref, h1_ref, acc_ref = rest
    elif shortcut == "identity":
        xsc_ref, o_ref, h1_ref, acc_ref = rest
    else:  # "none"
        o_ref, h1_ref, acc_ref = rest

    s = stride
    r = pl.program_id(1)
    row0 = r * hr                       # strip start in per-parity row coordinates
    pix = rows_par * Wp_s               # pixels of one parity strip (flattened)

    # ---- stage 1: expand 1x1 conv + BN1 + ReLU -> h1 scratch ----------------
    # The 0/1 mask zeroes the positions that correspond to conv2's zero padding
    # (must be applied AFTER the ReLU: relu(0 @ w + b) != 0 in general).
    for pr in range(s):
        for pc in range(s):
            p = pr * s + pc
            start = p * (Hp_s * Wp_s) + row0 * Wp_s
            xs = x_ref[0, pl.ds(start, pix), :].astype(w_dtype)      # (pix, Cin)
            h = jnp.dot(xs, w1_ref[...], preferred_element_type=jnp.float32)
            h = jnp.maximum(h + b1_ref[...], 0.0)
            h = h * m_ref[pl.ds(start, pix), :]                      # zero the pad halo
            h1_ref[p] = h.reshape(rows_par, Wp_s, planes)

    # ---- stage 2: depthwise 3x3 + BN2 + ReLU (stride folded into taps) ------
    for di in range(3):
        for dj in range(3):
            p = (di % s) * s + (dj % s)
            oi, oj = di // s, dj // s
            k = di * 3 + dj
            tap = h1_ref[p, oi:oi + hr, oj:oj + Wo, :] * w2_ref[k:k + 1, :]
            if k == 0:
                acc_ref[...] = tap
            else:
                acc_ref[...] += tap
    h2 = jnp.maximum(acc_ref[...] + b2_ref[...], 0.0)
    h2 = h2.reshape(hr * Wo, planes).astype(w_dtype)

    # ---- stage 3: project 1x1 + BN3 (+ fused shortcut) ----------------------
    y = jnp.dot(h2, w3_ref[...], preferred_element_type=jnp.float32) + b3_ref[...]
    if shortcut == "identity":
        y = y + xsc_ref[0].astype(jnp.float32)
    elif shortcut == "conv":
        xsc = xsc_ref[0].astype(w_dtype)
        y = y + jnp.dot(xsc, ws_ref[...], preferred_element_type=jnp.float32) + bs_ref[...]

    o_ref[0] = y.astype(o_ref.dtype)


# ---------------------------------------------------------------------------
# Wrapper
# ---------------------------------------------------------------------------
def _largest_divisor_leq(n, cap):
    for d in range(min(n, cap), 0, -1):
        if n % d == 0:
            return d
    return 1


def block_forward(x_nchw, params, in_planes, out_planes, expansion, stride,
                  *, strip_rows=8, weight_dtype=jnp.float32):
    """Forward pass of the Block.  x_nchw: (N, Cin, H, W) float32 -> (N, Cout, Ho, Wo)."""
    planes = expansion * in_planes
    N, Cin, H, W = x_nchw.shape
    assert Cin == in_planes
    s = int(stride)
    assert s in (1, 2), "fused kernel supports stride 1 or 2"
    assert H % s == 0 and W % s == 0, "spatial dims must be divisible by the stride"

    Ho, Wo = H // s, W // s
    Hp, Wp = H + 2, W + 2
    Hp_s, Wp_s = Hp // s, Wp // s
    hr = _largest_divisor_leq(Ho, strip_rows)        # output rows per strip
    n_strips = Ho // hr
    rows_par = hr + 2 // s                           # per-parity h1 rows a strip needs

    # TODO(synk): keep the surrounding model NHWC so this boundary transpose disappears.
    x = jnp.transpose(x_nchw, (0, 2, 3, 1)).astype(jnp.float32)          # NHWC
    x_pad = jnp.pad(x, ((0, 0), (1, 1), (1, 1), (0, 0)))                 # pad narrow input only

    # Space-to-batch parity split: x_par[n, p=pr*s+pc, i, j, :] = x_pad[n, s*i+pr, s*j+pc, :]
    # so the strided depthwise taps become contiguous slices in the kernel.
    x_par = x_pad.reshape(N, Hp_s, s, Wp_s, s, Cin)
    x_par = jnp.transpose(x_par, (0, 2, 4, 1, 3, 5)).reshape(N, s * s * Hp_s * Wp_s, Cin)

    # 0/1 mask that is 0 exactly at conv2's zero-padding positions (shared across batch).
    gi = jnp.arange(Hp_s)
    gj = jnp.arange(Wp_s)
    masks = []
    for pr in range(s):
        for pc in range(s):
            row_pad = s * gi + pr
            col_pad = s * gj + pc
            rbad = (row_pad == 0) | (row_pad == Hp - 1)
            cbad = (col_pad == 0) | (col_pad == Wp - 1)
            masks.append(jnp.where(rbad[:, None] | cbad[None, :], 0.0, 1.0))
    mask = jnp.stack(masks, 0).reshape(s * s * Hp_s * Wp_s, 1).astype(jnp.float32)

    # Fold inference-mode BN scales into the conv weights; keep biases/epilogues in f32.
    w1f = (params["w1"] * params["s1"][None, :]).astype(weight_dtype)
    b1 = params["b1"].reshape(1, planes).astype(jnp.float32)
    w2f = (params["w2"] * params["s2"][None, None, :]).reshape(9, planes).astype(jnp.float32)
    b2 = params["b2"].reshape(1, planes).astype(jnp.float32)
    w3f = (params["w3"] * params["s3"][None, :]).astype(weight_dtype)
    b3 = params["b3"].reshape(1, out_planes).astype(jnp.float32)

    if s == 1:
        shortcut = "identity" if in_planes == out_planes else "conv"
    else:
        shortcut = "none"

    p_all = s * s * Hp_s * Wp_s
    args = [x_par, mask, w1f, b1, w2f, b2, w3f, b3]
    in_specs = [
        pl.BlockSpec((1, p_all, Cin), lambda n, r: (n, 0, 0)),   # whole image, DMA'd once per n
        pl.BlockSpec((p_all, 1), lambda n, r: (0, 0)),
        pl.BlockSpec((Cin, planes), lambda n, r: (0, 0)),
        pl.BlockSpec((1, planes), lambda n, r: (0, 0)),
        pl.BlockSpec((9, planes), lambda n, r: (0, 0)),
        pl.BlockSpec((1, planes), lambda n, r: (0, 0)),
        pl.BlockSpec((planes, out_planes), lambda n, r: (0, 0)),
        pl.BlockSpec((1, out_planes), lambda n, r: (0, 0)),
    ]
    if shortcut == "conv":
        wsf = (params["ws"] * params["ss"][None, :]).astype(weight_dtype)
        bs = params["bs"].reshape(1, out_planes).astype(jnp.float32)
        args += [wsf, bs]
        in_specs += [pl.BlockSpec((Cin, out_planes), lambda n, r: (0, 0)),
                     pl.BlockSpec((1, out_planes), lambda n, r: (0, 0))]
    if shortcut != "none":
        x_sc = x.reshape(N, H * W, Cin)                          # un-padded pixels for shortcut
        args.append(x_sc)
        in_specs.append(pl.BlockSpec((1, hr * W, Cin), lambda n, r: (n, r, 0)))

    kernel = functools.partial(
        _block_kernel, stride=s, hr=hr, Wo=Wo, Hp_s=Hp_s, Wp_s=Wp_s,
        planes=planes, rows_par=rows_par, w_dtype=weight_dtype, shortcut=shortcut)

    out = pl.pallas_call(
        kernel,
        out_shape=jax.ShapeDtypeStruct((N, Ho * Wo, out_planes), jnp.float32),
        grid_spec=pltpu.PrefetchScalarGridSpec(
            num_scalar_prefetch=0,
            grid=(N, n_strips),
            in_specs=in_specs,
            out_specs=pl.BlockSpec((1, hr * Wo, out_planes), lambda n, r: (n, r, 0)),
            scratch_shapes=[
                pltpu.VMEM((s * s, rows_par, Wp_s, planes), jnp.float32),  # h1 strip
                pltpu.VMEM((hr, Wo, planes), jnp.float32),                 # depthwise acc
            ],
        ),
        compiler_params=pltpu.CompilerParams(
            dimension_semantics=("parallel", "parallel")),
    )(*args)

    out = out.reshape(N, Ho, Wo, out_planes)
    return jnp.transpose(out, (0, 3, 1, 2))  # back to NCHW


# ---------------------------------------------------------------------------
# Parameter init (deterministic) + BN folding
# ---------------------------------------------------------------------------
def fold_bn(gamma, beta, mean, var, eps=BN_EPS):
    scale = gamma / jnp.sqrt(var + eps)
    bias = beta - mean * scale
    return scale, bias


def init_block_params(key, in_planes, out_planes, expansion, stride):
    planes = expansion * in_planes
    k1, k2, k3, k4 = jax.random.split(key, 4)
    p = {}
    p["w1"] = 0.1 * jax.random.normal(k1, (in_planes, planes), jnp.float32)
    p["s1"], p["b1"] = fold_bn(jnp.ones(planes), jnp.zeros(planes),
                               jnp.zeros(planes), jnp.ones(planes))
    p["w2"] = 0.1 * jax.random.normal(k2, (3, 3, planes), jnp.float32)
    p["s2"], p["b2"] = fold_bn(jnp.ones(planes), jnp.zeros(planes),
                               jnp.zeros(planes), jnp.ones(planes))
    p["w3"] = 0.1 * jax.random.normal(k3, (planes, out_planes), jnp.float32)
    p["s3"], p["b3"] = fold_bn(jnp.ones(out_planes), jnp.zeros(out_planes),
                               jnp.zeros(out_planes), jnp.ones(out_planes))
    if stride == 1 and in_planes != out_planes:
        p["ws"] = 0.1 * jax.random.normal(k4, (in_planes, out_planes), jnp.float32)
        p["ss"], p["bs"] = fold_bn(jnp.ones(out_planes), jnp.zeros(out_planes),
                                   jnp.zeros(out_planes), jnp.ones(out_planes))
    return p


# ---------------------------------------------------------------------------
# Pure-JAX reference (correctness check)
# ---------------------------------------------------------------------------
def block_ref(x_nchw, p, in_planes, out_planes, expansion, stride):
    x = jnp.transpose(x_nchw, (0, 2, 3, 1))
    h1 = jnp.maximum(jnp.einsum("nhwc,cd->nhwd", x, p["w1"]) * p["s1"] + p["b1"], 0.0)
    xp = jnp.pad(h1, ((0, 0), (1, 1), (1, 1), (0, 0)))
    H, W = h1.shape[1], h1.shape[2]
    acc = jnp.zeros_like(h1)
    for di in range(3):
        for dj in range(3):
            acc = acc + xp[:, di:di + H, dj:dj + W, :] * p["w2"][di, dj, :]
    h2 = jnp.maximum(acc * p["s2"] + p["b2"], 0.0)
    if stride > 1:
        h2 = h2[:, ::stride, ::stride, :]
    out = jnp.einsum("nhwc,cd->nhwd", h2, p["w3"]) * p["s3"] + p["b3"]
    if stride == 1:
        if in_planes != out_planes:
            sc = jnp.einsum("nhwc,cd->nhwd", x, p["ws"]) * p["ss"] + p["bs"]
        else:
            sc = x
        out = out + sc
    return jnp.transpose(out, (0, 3, 1, 2))


# ---------------------------------------------------------------------------
if __name__ == "__main__":
    key = jax.random.PRNGKey(0)
    N, H, W = 2, 16, 16
    configs = [
        # (in_planes, out_planes, expansion, stride)
        (8, 16, 2, 1),    # conv shortcut path
        (16, 16, 3, 1),   # identity shortcut path
        (8, 24, 6, 2),    # strided path (stride folded into the kernel)
    ]
    for (cin, cout, exp, s) in configs:
        kx, kp, key = jax.random.split(key, 3)
        x = jax.random.normal(kx, (N, cin, H, W), jnp.float32)
        params = init_block_params(kp, cin, cout, exp, s)
        out = jax.block_until_ready(block_forward(x, params, cin, cout, exp, s))
        ref = block_ref(x, params, cin, cout, exp, s)
        np.testing.assert_allclose(np.asarray(out), np.asarray(ref),
                                   rtol=1e-4, atol=1e-4)

    # bf16-weight path (bf16 MXU on v6e/v7x, f32 accumulation) - loose-tolerance check.
    cin, cout, exp, s = configs[0]
    kx, kp, _ = jax.random.split(key, 3)
    x = jax.random.normal(kx, (N, cin, H, W), jnp.float32)
    params = init_block_params(kp, cin, cout, exp, s)
    out_bf16 = jax.block_until_ready(
        block_forward(x, params, cin, cout, exp, s, weight_dtype=jnp.bfloat16))
    ref = block_ref(x, params, cin, cout, exp, s)
    np.testing.assert_allclose(np.asarray(out_bf16), np.asarray(ref),
                               rtol=1e-1, atol=1e-1)

    print("KERNEL_OK")
</pallas_src>

<mosaic_0001>
module attributes {stable_mosaic.version = 11 : i64} {
  func.func @_block_kernel(%arg0: i32, %arg1: i32, %arg2: memref<1x324x8xf32, #tpu.memory_space<vmem>>, %arg3: memref<324x1xf32, #tpu.memory_space<vmem>>, %arg4: memref<8x16xf32, #tpu.memory_space<vmem>>, %arg5: memref<1x16xf32, #tpu.memory_space<vmem>>, %arg6: memref<9x16xf32, #tpu.memory_space<vmem>>, %arg7: memref<1x16xf32, #tpu.memory_space<vmem>>, %arg8: memref<16x16xf32, #tpu.memory_space<vmem>>, %arg9: memref<1x16xf32, #tpu.memory_space<vmem>>, %arg10: memref<8x16xf32, #tpu.memory_space<vmem>>, %arg11: memref<1x16xf32, #tpu.memory_space<vmem>>, %arg12: memref<1x128x8xf32, #tpu.memory_space<vmem>>, %arg13: memref<1x128x16xf32, #tpu.memory_space<vmem>>, %arg14: memref<1x10x18x16xf32, #tpu.memory_space<vmem>>, %arg15: memref<8x16x16xf32, #tpu.memory_space<vmem>>) attributes {dimension_semantics = [#tpu.dimension_semantics<parallel>, #tpu.dimension_semantics<parallel>], iteration_bounds = array<i64: 2, 2>, scalar_prefetch = 0 : i64, scratch_operands = 2 : i64, tpu.core_type = #tpu.core_type<tc>, window_params = [{transform_indices = @transform_0, window_bounds = array<i64: 1, 324, 8>}, {pipeline_mode = #tpu.pipeline_mode<synchronous>, transform_indices = @transform_1, window_bounds = array<i64: 324, 1>}, {pipeline_mode = #tpu.pipeline_mode<synchronous>, transform_indices = @transform_2, window_bounds = array<i64: 8, 16>}, {pipeline_mode = #tpu.pipeline_mode<synchronous>, transform_indices = @transform_3, window_bounds = array<i64: 1, 16>}, {pipeline_mode = #tpu.pipeline_mode<synchronous>, transform_indices = @transform_4, window_bounds = array<i64: 9, 16>}, {pipeline_mode = #tpu.pipeline_mode<synchronous>, transform_indices = @transform_5, window_bounds = array<i64: 1, 16>}, {pipeline_mode = #tpu.pipeline_mode<synchronous>, transform_indices = @transform_6, window_bounds = array<i64: 16, 16>}, {pipeline_mode = #tpu.pipeline_mode<synchronous>, transform_indices = @transform_7, window_bounds = array<i64: 1, 16>}, {pipeline_mode = #tpu.pipeline_mode<synchronous>, transform_indices = @transform_8, window_bounds = array<i64: 8, 16>}, {pipeline_mode = #tpu.pipeline_mode<synchronous>, transform_indices = @transform_9, window_bounds = array<i64: 1, 16>}, {transform_indices = @transform_10, window_bounds = array<i64: 1, 128, 8>}, {transform_indices = @transform_11, window_bounds = array<i64: 1, 128, 16>}]} {
    %c8_i32 = arith.constant 8 : i32
    %0 = arith.muli %arg1, %c8_i32 : i32
    %c18_i32 = arith.constant 18 : i32
    %1 = arith.muli %0, %c18_i32 : i32
    %c0_i32 = arith.constant 0 : i32
    %2 = arith.addi %c0_i32, %1 : i32
    %c0 = arith.constant 0 : index
    %3 = arith.index_cast %2 : i32 to index
    %c0_0 = arith.constant 0 : index
    %4 = vector.load %arg2[%c0, %3, %c0_0] : memref<1x324x8xf32, #tpu.memory_space<vmem>>, vector<1x180x8xf32>
    %5 = vector.shape_cast %4 : vector<1x180x8xf32> to vector<180x8xf32>
    %c0_1 = arith.constant 0 : index
    %c0_2 = arith.constant 0 : index
    %6 = vector.load %arg4[%c0_1, %c0_2] : memref<8x16xf32, #tpu.memory_space<vmem>>, vector<8x16xf32>
    %cst = arith.constant dense<0.000000e+00> : vector<180x16xf32>
    %7 = tpu.matmul %5, %6, %cst {dimension_numbers = #tpu.dot_dimension_numbers<[1], [0], [0], [1], [0, 0, 1, 1], [], []>} : vector<180x8xf32>, vector<8x16xf32>, vector<180x16xf32> -> vector<180x16xf32>
    %c0_3 = arith.constant 0 : index
    %c0_4 = arith.constant 0 : index
    %8 = vector.load %arg5[%c0_3, %c0_4] : memref<1x16xf32, #tpu.memory_space<vmem>>, vector<1x16xf32>
    %9 = vector.broadcast %8 : vector<1x16xf32> to vector<180x16xf32>
    %10 = arith.addf %7, %9 : vector<180x16xf32>
    %cst_5 = arith.constant 0.000000e+00 : f32
    %11 = vector.broadcast %cst_5 : f32 to vector<180x16xf32>
    %12 = arith.maximumf %10, %11 : vector<180x16xf32>
    %13 = arith.index_cast %2 : i32 to index
    %c0_6 = arith.constant 0 : index
    %14 = vector.load %arg3[%13, %c0_6] : memref<324x1xf32, #tpu.memory_space<vmem>>, vector<180x1xf32>
    %15 = vector.broadcast %14 : vector<180x1xf32> to vector<180x16xf32>
    %16 = arith.mulf %12, %15 : vector<180x16xf32>
    %17 = vector.shape_cast %16 : vector<180x16xf32> to vector<10x18x16xf32>
    %c0_7 = arith.constant 0 : index
    %c0_8 = arith.constant 0 : index
    %c0_9 = arith.constant 0 : index
    %c0_10 = arith.constant 0 : index
    %18 = vector.load %arg14[%c0_7, %c0_8, %c0_9, %c0_10] : memref<1x10x18x16xf32, #tpu.memory_space<vmem>>, vector<1x10x18x16xf32>
    %19 = vector.shape_cast %18 : vector<1x10x18x16xf32> to vector<10x18x16xf32>
    %20 = vector.shape_cast %17 : vector<10x18x16xf32> to vector<1x10x18x16xf32>
    tpu.vector_store %arg14[%c0_7, %c0_8, %c0_9, %c0_10], %20 {strides = array<i32>} : memref<1x10x18x16xf32, #tpu.memory_space<vmem>>, vector<1x10x18x16xf32>,
    %c0_11 = arith.constant 0 : index
    %c0_12 = arith.constant 0 : index
    %c0_13 = arith.constant 0 : index
    %c0_14 = arith.constant 0 : index
    %21 = vector.load %arg14[%c0_11, %c0_12, %c0_13, %c0_14] : memref<1x10x18x16xf32, #tpu.memory_space<vmem>>, vector<1x8x16x16xf32>
    %22 = vector.shape_cast %21 : vector<1x8x16x16xf32> to vector<8x16x16xf32>
    %c0_15 = arith.constant 0 : index
    %c0_16 = arith.constant 0 : index
    %23 = vector.load %arg6[%c0_15, %c0_16] : memref<9x16xf32, #tpu.memory_space<vmem>>, vector<1x16xf32>
    %24 = vector.shape_cast %23 : vector<1x16xf32> to vector<1x1x16xf32>
    %25 = vector.broadcast %24 : vector<1x1x16xf32> to vector<8x16x16xf32>
    %26 = arith.mulf %22, %25 : vector<8x16x16xf32>
    %c0_17 = arith.constant 0 : index
    %c0_18 = arith.constant 0 : index
    %c0_19 = arith.constant 0 : index
    %27 = vector.load %arg15[%c0_17, %c0_18, %c0_19] : memref<8x16x16xf32, #tpu.memory_space<vmem>>, vector<8x16x16xf32>
    tpu.vector_store %arg15[%c0_17, %c0_18, %c0_19], %26 {strides = array<i32>} : memref<8x16x16xf32, #tpu.memory_space<vmem>>, vector<8x16x16xf32>,
    %c0_20 = arith.constant 0 : index
    %c0_21 = arith.constant 0 : index
    %c1 = arith.constant 1 : index
    %c0_22 = arith.constant 0 : index
    %28 = vector.load %arg14[%c0_20, %c0_21, %c1, %c0_22] : memref<1x10x18x16xf32, #tpu.memory_space<vmem>>, vector<1x8x16x16xf32>
    %29 = vector.shape_cast %28 : vector<1x8x16x16xf32> to vector<8x16x16xf32>
    %c1_23 = arith.constant 1 : index
    %c0_24 = arith.constant 0 : index
    %30 = vector.load %arg6[%c1_23, %c0_24] : memref<9x16xf32, #tpu.memory_space<vmem>>, vector<1x16xf32>
    %31 = vector.shape_cast %30 : vector<1x16xf32> to vector<1x1x16xf32>
    %32 = vector.broadcast %31 : vector<1x1x16xf32> to vector<8x16x16xf32>
    %33 = arith.mulf %29, %32 : vector<8x16x16xf32>
    %c0_25 = arith.constant 0 : index
    %c0_26 = arith.constant 0 : index
    %c0_27 = arith.constant 0 : index
    %34 = vector.load %arg15[%c0_25, %c0_26, %c0_27] : memref<8x16x16xf32, #tpu.memory_space<vmem>>, vector<8x16x16xf32>
    %35 = arith.addf %34, %33 : vector<8x16x16xf32>
    %c0_28 = arith.constant 0 : index
    %c0_29 = arith.constant 0 : index
    %c0_30 = arith.constant 0 : index
    %36 = vector.load %arg15[%c0_28, %c0_29, %c0_30] : memref<8x16x16xf32, #tpu.memory_space<vmem>>, vector<8x16x16xf32>
    tpu.vector_store %arg15[%c0_28, %c0_29, %c0_30], %35 {strides = array<i32>} : memref<8x16x16xf32, #tpu.memory_space<vmem>>, vector<8x16x16xf32>,
    %c0_31 = arith.constant 0 : index
    %c0_32 = arith.constant 0 : index
    %c2 = arith.constant 2 : index
    %c0_33 = arith.constant 0 : index
    %37 = vector.load %arg14[%c0_31, %c0_32, %c2, %c0_33] : memref<1x10x18x16xf32, #tpu.memory_space<vmem>>, vector<1x8x16x16xf32>
    %38 = vector.shape_cast %37 : vector<1x8x16x16xf32> to vector<8x16x16xf32>
    %c2_34 = arith.constant 2 : index
    %c0_35 = arith.constant 0 : index
    %39 = vector.load %arg6[%c2_34, %c0_35] : memref<9x16xf32, #tpu.memory_space<vmem>>, vector<1x16xf32>
    %40 = vector.shape_cast %39 : vector<1x16xf32> to vector<1x1x16xf32>
    %41 = vector.broadcast %40 : vector<1x1x16xf32> to vector<8x16x16xf32>
    %42 = arith.mulf %38, %41 : vector<8x16x16xf32>
    %c0_36 = arith.constant 0 : index
    %c0_37 = arith.constant 0 : index
    %c0_38 = arith.constant 0 : index
    %43 = vector.load %arg15[%c0_36, %c0_37, %c0_38] : memref<8x16x16xf32, #tpu.memory_space<vmem>>, vector<8x16x16xf32>
    %44 = arith.addf %43, %42 : vector<8x16x16xf32>
    %c0_39 = arith.constant 0 : index
    %c0_40 = arith.constant 0 : index
    %c0_41 = arith.constant 0 : index
    %45 = vector.load %arg15[%c0_39, %c0_40, %c0_41] : memref<8x16x16xf32, #tpu.memory_space<vmem>>, vector<8x16x16xf32>
    tpu.vector_store %arg15[%c0_39, %c0_40, %c0_41], %44 {strides = array<i32>} : memref<8x16x16xf32, #tpu.memory_space<vmem>>, vector<8x16x16xf32>,
    %c0_42 = arith.constant 0 : index
    %c1_43 = arith.constant 1 : index
    %c0_44 = arith.constant 0 : index
    %c0_45 = arith.constant 0 : index
    %46 = vector.load %arg14[%c0_42, %c1_43, %c0_44, %c0_45] : memref<1x10x18x16xf32, #tpu.memory_space<vmem>>, vector<1x8x16x16xf32>
    %47 = vector.shape_cast %46 : vector<1x8x16x16xf32> to vector<8x16x16xf32>
    %c3 = arith.constant 3 : index
    %c0_46 = arith.constant 0 : index
    %48 = vector.load %arg6[%c3, %c0_46] : memref<9x16xf32, #tpu.memory_space<vmem>>, vector<1x16xf32>
    %49 = vector.shape_cast %48 : vector<1x16xf32> to vector<1x1x16xf32>
    %50 = vector.broadcast %49 : vector<1x1x16xf32> to vector<8x16x16xf32>
    %51 = arith.mulf %47, %50 : vector<8x16x16xf32>
    %c0_47 = arith.constant 0 : index
    %c0_48 = arith.constant 0 : index
    %c0_49 = arith.constant 0 : index
    %52 = vector.load %arg15[%c0_47, %c0_48, %c0_49] : memref<8x16x16xf32, #tpu.memory_space<vmem>>, vector<8x16x16xf32>
    %53 = arith.addf %52, %51 : vector<8x16x16xf32>
    %c0_50 = arith.constant 0 : index
    %c0_51 = arith.constant 0 : index
    %c0_52 = arith.constant 0 : index
    %54 = vector.load %arg15[%c0_50, %c0_51, %c0_52] : memref<8x16x16xf32, #tpu.memory_space<vmem>>, vector<8x16x16xf32>
    tpu.vector_store %arg15[%c0_50, %c0_51, %c0_52], %53 {strides = array<i32>} : memref<8x16x16xf32, #tpu.memory_space<vmem>>, vector<8x16x16xf32>,
    %c0_53 = arith.constant 0 : index
    %c1_54 = arith.constant 1 : index
    %c1_55 = arith.constant 1 : index
    %c0_56 = arith.constant 0 : index
    %55 = vector.load %arg14[%c0_53, %c1_54, %c1_55, %c0_56] : memref<1x10x18x16xf32, #tpu.memory_space<vmem>>, vector<1x8x16x16xf32>
    %56 = vector.shape_cast %55 : vector<1x8x16x16xf32> to vector<8x16x16xf32>
    %c4 = arith.constant 4 : index
    %c0_57 = arith.constant 0 : index
    %57 = vector.load %arg6[%c4, %c0_57] : memref<9x16xf32, #tpu.memory_space<vmem>>, vector<1x16xf32>
    %58 = vector.shape_cast %57 : vector<1x16xf32> to vector<1x1x16xf32>
    %59 = vector.broadcast %58 : vector<1x1x16xf32> to vector<8x16x16xf32>
    %60 = arith.mulf %56, %59 : vector<8x16x16xf32>
    %c0_58 = arith.constant 0 : index
    %c0_59 = arith.constant 0 : index
    %c0_60 = arith.constant 0 : index
    %61 = vector.load %arg15[%c0_58, %c0_59, %c0_60] : memref<8x16x16xf32, #tpu.memory_space<vmem>>, vector<8x16x16xf32>
    %62 = arith.addf %61, %60 : vector<8x16x16xf32>
    %c0_61 = arith.constant 0 : index
    %c0_62 = arith.constant 0 : index
    %c0_63 = arith.constant 0 : index
    %63 = vector.load %arg15[%c0_61, %c0_62, %c0_63] : memref<8x16x16xf32, #tpu.memory_space<vmem>>, vector<8x16x16xf32>
    tpu.vector_store %arg15[%c0_61, %c0_62, %c0_63], %62 {strides = array<i32>} : memref<8x16x16xf32, #tpu.memory_space<vmem>>, vector<8x16x16xf32>,
    %c0_64 = arith.constant 0 : index
    %c1_65 = arith.constant 1 : index
    %c2_66 = arith.constant 2 : index
    %c0_67 = arith.constant 0 : index
    %64 = vector.load %arg14[%c0_64, %c1_65, %c2_66, %c0_67] : memref<1x10x18x16xf32, #tpu.memory_space<vmem>>, vector<1x8x16x16xf32>
    %65 = vector.shape_cast %64 : vector<1x8x16x16xf32> to vector<8x16x16xf32>
    %c5 = arith.constant 5 : index
    %c0_68 = arith.constant 0 : index
    %66 = vector.load %arg6[%c5, %c0_68] : memref<9x16xf32, #tpu.memory_space<vmem>>, vector<1x16xf32>
    %67 = vector.shape_cast %66 : vector<1x16xf32> to vector<1x1x16xf32>
    %68 = vector.broadcast %67 : vector<1x1x16xf32> to vector<8x16x16xf32>
    %69 = arith.mulf %65, %68 : vector<8x16x16xf32>
    %c0_69 = arith.constant 0 : index
    %c0_70 = arith.constant 0 : index
    %c0_71 = arith.constant 0 : index
    %70 = vector.load %arg15[%c0_69, %c0_70, %c0_71] : memref<8x16x16xf32, #tpu.memory_space<vmem>>, vector<8x16x16xf32>
    %71 = arith.addf %70, %69 : vector<8x16x16xf32>
    %c0_72 = arith.constant 0 : index
    %c0_73 = arith.constant 0 : index
    %c0_74 = arith.constant 0 : index
    %72 = vector.load %arg15[%c0_72, %c0_73, %c0_74] : memref<8x16x16xf32, #tpu.memory_space<vmem>>, vector<8x16x16xf32>
    tpu.vector_store %arg15[%c0_72, %c0_73, %c0_74], %71 {strides = array<i32>} : memref<8x16x16xf32, #tpu.memory_space<vmem>>, vector<8x16x16xf32>,
    %c0_75 = arith.constant 0 : index
    %c2_76 = arith.constant 2 : index
    %c0_77 = arith.constant 0 : index
    %c0_78 = arith.constant 0 : index
    %73 = vector.load %arg14[%c0_75, %c2_76, %c0_77, %c0_78] : memref<1x10x18x16xf32, #tpu.memory_space<vmem>>, vector<1x8x16x16xf32>
    %74 = vector.shape_cast %73 : vector<1x8x16x16xf32> to vector<8x16x16xf32>
    %c6 = arith.constant 6 : index
    %c0_79 = arith.constant 0 : index
    %75 = vector.load %arg6[%c6, %c0_79] : memref<9x16xf32, #tpu.memory_space<vmem>>, vector<1x16xf32>
    %76 = vector.shape_cast %75 : vector<1x16xf32> to vector<1x1x16xf32>
    %77 = vector.broadcast %76 : vector<1x1x16xf32> to vector<8x16x16xf32>
    %78 = arith.mulf %74, %77 : vector<8x16x16xf32>
    %c0_80 = arith.constant 0 : index
    %c0_81 = arith.constant 0 : index
    %c0_82 = arith.constant 0 : index
    %79 = vector.load %arg15[%c0_80, %c0_81, %c0_82] : memref<8x16x16xf32, #tpu.memory_space<vmem>>, vector<8x16x16xf32>
    %80 = arith.addf %79, %78 : vector<8x16x16xf32>
    %c0_83 = arith.constant 0 : index
    %c0_84 = arith.constant 0 : index
    %c0_85 = arith.constant 0 : index
    %81 = vector.load %arg15[%c0_83, %c0_84, %c0_85] : memref<8x16x16xf32, #tpu.memory_space<vmem>>, vector<8x16x16xf32>
    tpu.vector_store %arg15[%c0_83, %c0_84, %c0_85], %80 {strides = array<i32>} : memref<8x16x16xf32, #tpu.memory_space<vmem>>, vector<8x16x16xf32>,
    %c0_86 = arith.constant 0 : index
    %c2_87 = arith.constant 2 : index
    %c1_88 = arith.constant 1 : index
    %c0_89 = arith.constant 0 : index
    %82 = vector.load %arg14[%c0_86, %c2_87, %c1_88, %c0_89] : memref<1x10x18x16xf32, #tpu.memory_space<vmem>>, vector<1x8x16x16xf32>
    %83 = vector.shape_cast %82 : vector<1x8x16x16xf32> to vector<8x16x16xf32>
    %c7 = arith.constant 7 : index
    %c0_90 = arith.constant 0 : index
    %84 = vector.load %arg6[%c7, %c0_90] : memref<9x16xf32, #tpu.memory_space<vmem>>, vector<1x16xf32>
    %85 = vector.shape_cast %84 : vector<1x16xf32> to vector<1x1x16xf32>
    %86 = vector.broadcast %85 : vector<1x1x16xf32> to vector<8x16x16xf32>
    %87 = arith.mulf %83, %86 : vector<8x16x16xf32>
    %c0_91 = arith.constant 0 : index
    %c0_92 = arith.constant 0 : index
    %c0_93 = arith.constant 0 : index
    %88 = vector.load %arg15[%c0_91, %c0_92, %c0_93] : memref<8x16x16xf32, #tpu.memory_space<vmem>>, vector<8x16x16xf32>
    %89 = arith.addf %88, %87 : vector<8x16x16xf32>
    %c0_94 = arith.constant 0 : index
    %c0_95 = arith.constant 0 : index
    %c0_96 = arith.constant 0 : index
    %90 = vector.load %arg15[%c0_94, %c0_95, %c0_96] : memref<8x16x16xf32, #tpu.memory_space<vmem>>, vector<8x16x16xf32>
    tpu.vector_store %arg15[%c0_94, %c0_95, %c0_96], %89 {strides = array<i32>} : memref<8x16x16xf32, #tpu.memory_space<vmem>>, vector<8x16x16xf32>,
    %c0_97 = arith.constant 0 : index
    %c2_98 = arith.constant 2 : index
    %c2_99 = arith.constant 2 : index
    %c0_100 = arith.constant 0 : index
    %91 = vector.load %arg14[%c0_97, %c2_98, %c2_99, %c0_100] : memref<1x10x18x16xf32, #tpu.memory_space<vmem>>, vector<1x8x16x16xf32>
    %92 = vector.shape_cast %91 : vector<1x8x16x16xf32> to vector<8x16x16xf32>
    %c8 = arith.constant 8 : index
    %c0_101 = arith.constant 0 : index
    %93 = vector.load %arg6[%c8, %c0_101] : memref<9x16xf32, #tpu.memory_space<vmem>>, vector<1x16xf32>
    %94 = vector.shape_cast %93 : vector<1x16xf32> to vector<1x1x16xf32>
    %95 = vector.broadcast %94 : vector<1x1x16xf32> to vector<8x16x16xf32>
    %96 = arith.mulf %92, %95 : vector<8x16x16xf32>
    %c0_102 = arith.constant 0 : index
    %c0_103 = arith.constant 0 : index
    %c0_104 = arith.constant 0 : index
    %97 = vector.load %arg15[%c0_102, %c0_103, %c0_104] : memref<8x16x16xf32, #tpu.memory_space<vmem>>, vector<8x16x16xf32>
    %98 = arith.addf %97, %96 : vector<8x16x16xf32>
    %c0_105 = arith.constant 0 : index
    %c0_106 = arith.constant 0 : index
    %c0_107 = arith.constant 0 : index
    %99 = vector.load %arg15[%c0_105, %c0_106, %c0_107] : memref<8x16x16xf32, #tpu.memory_space<vmem>>, vector<8x16x16xf32>
    tpu.vector_store %arg15[%c0_105, %c0_106, %c0_107], %98 {strides = array<i32>} : memref<8x16x16xf32, #tpu.memory_space<vmem>>, vector<8x16x16xf32>,
    %c0_108 = arith.constant 0 : index
    %c0_109 = arith.constant 0 : index
    %c0_110 = arith.constant 0 : index
    %100 = vector.load %arg15[%c0_108, %c0_109, %c0_110] : memref<8x16x16xf32, #tpu.memory_space<vmem>>, vector<8x16x16xf32>
    %c0_111 = arith.constant 0 : index
    %c0_112 = arith.constant 0 : index
    %101 = vector.load %arg7[%c0_111, %c0_112] : memref<1x16xf32, #tpu.memory_space<vmem>>, vector<1x16xf32>
    %102 = vector.shape_cast %101 : vector<1x16xf32> to vector<1x1x16xf32>
    %103 = vector.broadcast %102 : vector<1x1x16xf32> to vector<8x16x16xf32>
    %104 = arith.addf %100, %103 : vector<8x16x16xf32>
    %cst_113 = arith.constant 0.000000e+00 : f32
    %105 = vector.broadcast %cst_113 : f32 to vector<8x16x16xf32>
    %106 = arith.maximumf %104, %105 : vector<8x16x16xf32>
    %107 = vector.shape_cast %106 : vector<8x16x16xf32> to vector<128x16xf32>
    %c0_114 = arith.constant 0 : index
    %c0_115 = arith.constant 0 : index
    %108 = vector.load %arg8[%c0_114, %c0_115] : memref<16x16xf32, #tpu.memory_space<vmem>>, vector<16x16xf32>
    %cst_116 = arith.constant dense<0.000000e+00> : vector<128x16xf32>
    %109 = tpu.matmul %107, %108, %cst_116 {dimension_numbers = #tpu.dot_dimension_numbers<[1], [0], [0], [1], [0, 0, 1, 1], [], []>} : vector<128x16xf32>, vector<16x16xf32>, vector<128x16xf32> -> vector<128x16xf32>
    %c0_117 = arith.constant 0 : index
    %c0_118 = arith.constant 0 : index
    %110 = vector.load %arg9[%c0_117, %c0_118] : memref<1x16xf32, #tpu.memory_space<vmem>>, vector<1x16xf32>
    %111 = vector.broadcast %110 : vector<1x16xf32> to vector<128x16xf32>
    %112 = arith.addf %109, %111 : vector<128x16xf32>
    %c0_119 = arith.constant 0 : index
    %c0_120 = arith.constant 0 : index
    %c0_121 = arith.constant 0 : index
    %113 = vector.load %arg12[%c0_119, %c0_120, %c0_121] : memref<1x128x8xf32, #tpu.memory_space<vmem>>, vector<1x128x8xf32>
    %114 = vector.shape_cast %113 : vector<1x128x8xf32> to vector<128x8xf32>
    %c0_122 = arith.constant 0 : index
    %c0_123 = arith.constant 0 : index
    %115 = vector.load %arg10[%c0_122, %c0_123] : memref<8x16xf32, #tpu.memory_space<vmem>>, vector<8x16xf32>
    %cst_124 = arith.constant dense<0.000000e+00> : vector<128x16xf32>
    %116 = tpu.matmul %114, %115, %cst_124 {dimension_numbers = #tpu.dot_dimension_numbers<[1], [0], [0], [1], [0, 0, 1, 1], [], []>} : vector<128x8xf32>, vector<8x16xf32>, vector<128x16xf32> -> vector<128x16xf32>
    %117 = arith.addf %112, %116 : vector<128x16xf32>
    %c0_125 = arith.constant 0 : index
    %c0_126 = arith.constant 0 : index
    %118 = vector.load %arg11[%c0_125, %c0_126] : memref<1x16xf32, #tpu.memory_space<vmem>>, vector<1x16xf32>
    %119 = vector.broadcast %118 : vector<1x16xf32> to vector<128x16xf32>
    %120 = arith.addf %117, %119 : vector<128x16xf32>
    %c0_127 = arith.constant 0 : index
    %c0_128 = arith.constant 0 : index
    %c0_129 = arith.constant 0 : index
    %121 = vector.load %arg13[%c0_127, %c0_128, %c0_129] : memref<1x128x16xf32, #tpu.memory_space<vmem>>, vector<1x128x16xf32>
    %122 = vector.shape_cast %121 : vector<1x128x16xf32> to vector<128x16xf32>
    %123 = vector.shape_cast %120 : vector<128x16xf32> to vector<1x128x16xf32>
    tpu.vector_store %arg13[%c0_127, %c0_128, %c0_129], %123 {strides = array<i32>} : memref<1x128x16xf32, #tpu.memory_space<vmem>>, vector<1x128x16xf32>,
    return
  }
  func.func @transform_0(%arg0: i32, %arg1: i32) -> (i32, i32, i32) {
    %c0_i32 = arith.constant 0 : i32
    %c0_i32_0 = arith.constant 0 : i32
    %c0_i32_1 = arith.constant 0 : i32
    return %arg0, %c0_i32, %c0_i32_0 : i32, i32, i32
  }
  func.func @transform_1(%arg0: i32, %arg1: i32) -> (i32, i32) {
    %c0_i32 = arith.constant 0 : i32
    %c0_i32_0 = arith.constant 0 : i32
    %c0_i32_1 = arith.constant 0 : i32
    return %c0_i32, %c0_i32_0 : i32, i32
  }
  func.func @transform_2(%arg0: i32, %arg1: i32) -> (i32, i32) {
    %c0_i32 = arith.constant 0 : i32
    %c0_i32_0 = arith.constant 0 : i32
    %c0_i32_1 = arith.constant 0 : i32
    return %c0_i32, %c0_i32_0 : i32, i32
  }
  func.func @transform_3(%arg0: i32, %arg1: i32) -> (i32, i32) {
    %c0_i32 = arith.constant 0 : i32
    %c0_i32_0 = arith.constant 0 : i32
    %c0_i32_1 = arith.constant 0 : i32
    return %c0_i32, %c0_i32_0 : i32, i32
  }
  func.func @transform_4(%arg0: i32, %arg1: i32) -> (i32, i32) {
    %c0_i32 = arith.constant 0 : i32
    %c0_i32_0 = arith.constant 0 : i32
    %c0_i32_1 = arith.constant 0 : i32
    return %c0_i32, %c0_i32_0 : i32, i32
  }
  func.func @transform_5(%arg0: i32, %arg1: i32) -> (i32, i32) {
    %c0_i32 = arith.constant 0 : i32
    %c0_i32_0 = arith.constant 0 : i32
    %c0_i32_1 = arith.constant 0 : i32
    return %c0_i32, %c0_i32_0 : i32, i32
  }
  func.func @transform_6(%arg0: i32, %arg1: i32) -> (i32, i32) {
    %c0_i32 = arith.constant 0 : i32
    %c0_i32_0 = arith.constant 0 : i32
    %c0_i32_1 = arith.constant 0 : i32
    return %c0_i32, %c0_i32_0 : i32, i32
  }
  func.func @transform_7(%arg0: i32, %arg1: i32) -> (i32, i32) {
    %c0_i32 = arith.constant 0 : i32
    %c0_i32_0 = arith.constant 0 : i32
    %c0_i32_1 = arith.constant 0 : i32
    return %c0_i32, %c0_i32_0 : i32, i32
  }
  func.func @transform_8(%arg0: i32, %arg1: i32) -> (i32, i32) {
    %c0_i32 = arith.constant 0 : i32
    %c0_i32_0 = arith.constant 0 : i32
    %c0_i32_1 = arith.constant 0 : i32
    return %c0_i32, %c0_i32_0 : i32, i32
  }
  func.func @transform_9(%arg0: i32, %arg1: i32) -> (i32, i32) {
    %c0_i32 = arith.constant 0 : i32
    %c0_i32_0 = arith.constant 0 : i32
    %c0_i32_1 = arith.constant 0 : i32
    return %c0_i32, %c0_i32_0 : i32, i32
  }
  func.func @transform_10(%arg0: i32, %arg1: i32) -> (i32, i32, i32) {
    %c0_i32 = arith.constant 0 : i32
    %c0_i32_0 = arith.constant 0 : i32
    return %arg0, %arg1, %c0_i32 : i32, i32, i32
  }
  func.func @transform_11(%arg0: i32, %arg1: i32) -> (i32, i32, i32) {
    %c0_i32 = arith.constant 0 : i32
    %c0_i32_0 = arith.constant 0 : i32
    return %arg0, %arg1, %c0_i32 : i32, i32, i32
  }
}

</mosaic_0001>

<bundles_post_ra>
// kernel: tpu_custom_call.1
= control target key start
LH: loop header
LB: loop body
LE: loop exit
PB: predicated region body
PF: predicated region fallthrough
CT: control target
= control target key end

     0   :  { %s3583_s17 = smov 0   ;;  %s3585_s18 = smov 0   ;;  %s4865_s0 = inlined_call_operand.vmem [shape: f32[2,324,8], index: 0, kind: input, shape index: {}]   ;;  %s4866_s1 = inlined_call_operand.vmem [shape: f32[324,1], index: 1, kind: input, shape index: {}]   ;;  %s4867_s2 = inlined_call_operand.vmem [shape: f32[8,16], index: 2, kind: input, shape index: {}]   ;;  %s4868_s3 = inlined_call_operand.vmem [shape: f32[1,16], index: 3, kind: input, shape index: {}]   ;;  %s4869_s4 = inlined_call_operand.vmem [shape: f32[9,16], index: 4, kind: input, shape index: {}]   ;;  %s4870_s5 = inlined_call_operand.vmem [shape: f32[1,16], index: 5, kind: input, shape index: {}]   ;;  %s4871_s6 = inlined_call_operand.vmem [shape: f32[16,16], index: 6, kind: input, shape index: {}]   ;;  %s4872_s7 = inlined_call_operand.vmem [shape: f32[1,16], index: 7, kind: input, shape index: {}]   ;;  %s4873_s8 = inlined_call_operand.vmem [shape: f32[8,16], index: 8, kind: input, shape index: {}]   ;;  %s4874_s9 = inlined_call_operand.vmem [shape: f32[1,16], index: 9, kind: input, shape index: {}]   ;;  %s4875_s10 = inlined_call_operand.vmem [shape: f32[2,256,8], index: 10, kind: input, shape index: {}]   ;;  %s4876_s11 = inlined_call_operand.vmem [shape: f32[2,256,16], index: 11, kind: output, shape index: {}]  }
   0x1   :  { %s3587_s19 = smov 0   ;;  %s3589_s20 = smov 0  }
   0x2   :  { %s3591_s21 = smov 0  }
   0x3 LB: > { %s30_s22 = sadd.s32 1, %s3509_s19  ;;  %s33_s23 = sadd.s32 1, %s3513_s20  ;;  %s3517_s21 = sphi %s3591_s21, %s21_s21   ;;  %s3513_s20 = sphi %s3589_s20, %s4880_s20   ;;  %s3509_s19 = sphi %s3587_s19, %s4879_s19   ;;  %s3505_s18 = sphi %s3585_s18, %s4878_s18   ;;  %s3501_s17 = sphi %s3583_s17, %s4877_s17  }
   0x4   : > { %p31_p0 = scmp.ge.s32.totalorder %s30_s22, 2  ;;  %p3158_p1 = scmp.ge.s32.totalorder %s3517_s21, 1 }
   0x5   : > { %p368_p2 = scmp.lt.s32.totalorder %s3517_s21, 5 }
   0x6   : > { %s4882_s22 = smov (%p31_p0, %s30_s22), 0  ;;  %s4884_s23 = smov (!%p31_p0, %s33_s23), %s3513_s20 }
   0x7   : > { %p369_p3 = pnand %p3158_p1, %p368_p2  ;;  %p35_p4 = scmp.ge.s32.totalorder %s4884_s23, 2 }
   0x8   : > { %p421_p5 = scmp.lt.s32.totalorder (!%p369_p3), %s3505_s18, 1  ;;  %s446_s26 = smul.u32 (!%p369_p3), 144, %s3501_s17 }
   0x9   : > { %s4886_s23 = smov (%p35_p4, %s4884_s23), 0  ;;  %372 = sbr.rel (%p369_p3) target bundleno = 673 (0x2a1), region = 64 }
   0xa   : > { %s3630_s29 = scalar_lea.vmem (!%p369_p3), %s4866_s1, %s446_s26  ;;  %s3160_s16 = sshll.u32 (!%p369_p3), %s3501_s17, 4 }
   0xb   : > { %p429_p6 = scmp.lt.s32.totalorder (!%p369_p3), %s3160_s16, 31 }
   0xe   : > { %v471_v0 = vld [vmem:[%s4867_s2] sm:$0xff]  ;;  %v3519_v1 = vmov 0.0   ;;  %vm3520_vm0 = vmmov 0   ;;  %s4888_s18 = smov (!%p421_p5, %s3505_s18), 1  ;;  %v3521_v2 = vmov 0   ;;  %v755_v3 = vld [vmem:[%s3630_s29 + $0x10] sm:$0xff] }
   0xf   : > { %3295 = vmatprep.subr.mxu0 %v3519_v1  ;;  %3297 = vmatprep.mubr.msk.f32.mxu0 %vm3520_vm0, %v3519_v1  ;;  %s3422_s30 = smul.u32 328, %s4888_s18  ;;  %v753_v4 = vld [vmem:[%s3630_s29] sm:$0xff]  ;;  %vm479_vm1 = vcmask 64512   ;;  %v756_v5 = vld [vmem:[%s3630_s29 + $0x18] sm:$0xff]  ;;  %v754_v6 = vld [vmem:[%s3630_s29 + $0x8] sm:$0xff]  ;;  %vm1759_vm2 = vcmask 130048  }
  0x10   : > { %3296 = vmatpush3.msra.mxu0 %v471_v0  ;;  %3420 = vmatprep.subr.mxu1 %v3519_v1  ;;  %v758_v10 = vld [vmem:[%s3630_s29 + $0x28] sm:$0xff]  ;;  %v757_v11 = vld [vmem:[%s3630_s29 + $0x20] sm:$0xff]  ;;  %v760_v14 = vld [vmem:[%s3630_s29 + $0x38] sm:$0xff]  ;;  %vm1762_vm3 = vcmask 123904   ;;  %s4890_s16 = smov (!%p429_p6, %s3160_s16), 31  ;;  %s3161_s24 = sshll.u32 %s4888_s18, 5 }
  0x11   : > { %3421 = vmatpush3.msra.mxu1 %v471_v0  ;;  %3357 = vmatprep.mubr.msk.f32.mxu1 %vm3520_vm0, %v3519_v1  ;;  %s425_s14 = scalar_lea.vmem %s4865_s0, %s3422_s30  ;;  %v759_v15 = vld [vmem:[%s3630_s29 + $0x30] sm:$0xff]  ;;  %v762_v18 = vld [vmem:[%s3630_s29 + $0x48] sm:$0xff]  ;;  %v761_v19 = vld [vmem:[%s3630_s29 + $0x40] sm:$0xff]  ;;  %s4715_s17 = sadd.s32 %s3161_s24, %s4890_s16 }
  0x12   : > { %3468 = vset.pattern.permute.xlu1 %v3521_v2  ;;  %3467 = vset.pattern.permute.xlu0 %v3521_v2  ;;  %s3639_s15 = scalar_lea.vmem %s425_s14, %s446_s26  ;;  %v764_v21 = vld [vmem:[%s3630_s29 + $0x58] sm:$0xff]  ;;  %v763_v22 = vld [vmem:[%s3630_s29 + $0x50] sm:$0xff]  ;;  %v766_v24 = vld [vmem:[%s3630_s29 + $0x68] sm:$0xff]  ;;  %s3162_s25 = sshll.u32 %s4715_s17, 3 }
  0x13   : > { %788 = vperm.xlu1 %3468, %v755_v3   ;;  %778 = vperm.xlu0 %3467, %v753_v4   ;;  %v448_v7 = vld [vmem:[%s3639_s15] sm:$0xff]  ;;  %v449_v8 = vld [vmem:[%s3639_s15 + $0x8] sm:$0xff]  ;;  %v450_v13 = vld [vmem:[%s3639_s15 + $0x10] sm:$0xff]  ;;  %v941_v3 = vlaneseq  ;;  %s4724_s28 = scalar_lea.vmem %s4875_s10, %s3162_s25 }
  0x14   : > { %3298 = vmatmul.mubr.msk.f32.vlgmr.msra.gmra.mxu0 %vm479_vm1, %v448_v7  ;;  %v468_v9 = vld [vmem:[%s3639_s15 + $0xa0] sm:$0xff]  ;;  %v469_v12 = vld [vmem:[%s3639_s15 + $0xa8] sm:$0xff]  ;;  %v470_v16 = vld [vmem:[%s3639_s15 + $0xb0] sm:$0xf] }
  0x15   : > { %3300 = vmatprep.mubr.msk.f32.mxu0 %vm3520_vm0, %v3519_v1  ;;  %3358 = vmatmul.mubr.msk.f32.vlgmr.msra.gmra.mxu1 %vm479_vm1, %v468_v9  ;;  %v451_v17 = vld [vmem:[%s3639_s15 + $0x18] sm:$0xff]  ;;  %v452_v20 = vld [vmem:[%s3639_s15 + $0x20] sm:$0xff]  ;;  %v453_v23 = vld [vmem:[%s3639_s15 + $0x28] sm:$0xff]  ;;  %v942_v7 = vshrl.u32 %v941_v3, 7 }
  0x16   : > { %3360 = vmatprep.mubr.msk.f32.mxu1 %vm3520_vm0, %v3519_v1  ;;  %v765_v25 = vld [vmem:[%s3630_s29 + $0x60] sm:$0xff]  ;;  %v454_v26 = vld [vmem:[%s3639_s15 + $0x30] sm:$0xff]  ;;  %v768_v27 = vld [vmem:[%s3630_s29 + $0x78] sm:$0xff] }
  0x17   : > { %793 = vperm.xlu1 %3468, %v756_v5   ;;  %783 = vperm.xlu0 %3467, %v754_v6   ;;  %v767_v28 = vld [vmem:[%s3630_s29 + $0x70] sm:$0xff]  ;;  %v455_v29 = vld [vmem:[%s3639_s15 + $0x38] sm:$0xff]  ;;  %v770_v30 = vld [vmem:[%s3630_s29 + $0x88] sm:$0xff] }
  0x18   : > { %3301 = vmatmul.mubr.msk.f32.gmra.mxu0 %vm479_vm1, %v449_v8  ;;  %v769_v31 = vld [vmem:[%s3630_s29 + $0x80] sm:$0xff]  ;;  %v772_v33 = vld [vmem:[%s3630_s29 + $0x98] sm:$0xff]  ;;  %v771_v34 = vld [vmem:[%s3630_s29 + $0x90] sm:$0xff] }
  0x19   : > { %3303 = vmatprep.mubr.msk.f32.mxu0 %vm3520_vm0, %v3519_v1  ;;  %3361 = vmatmul.mubr.msk.f32.gmra.mxu1 %vm479_vm1, %v469_v12  ;;  %v456_v32 = vld [vmem:[%s3639_s15 + $0x40] sm:$0xff]  ;;  %v457_v35 = vld [vmem:[%s3639_s15 + $0x48] sm:$0xff]  ;;  %v458_v38 = vld [vmem:[%s3639_s15 + $0x50] sm:$0xff] }
  0x1a   : > { %3363 = vmatprep.mubr.msk.f32.mxu1 %vm3520_vm0, %v3519_v1  ;;  %v774_v36 = vld [vmem:[%s3630_s29 + $0xa8] sm:$0xff]  ;;  %v773_v37 = vld [vmem:[%s3630_s29 + $0xa0] sm:$0xff]  ;;  %v775_v39 = vld [vmem:[%s3630_s29 + $0xb0] sm:$0xf] }
  0x1b   : > { %803 = vperm.xlu1 %3468, %v758_v10   ;;  %798 = vperm.xlu0 %3467, %v757_v11   ;;  %v459_v40 = vld [vmem:[%s3639_s15 + $0x58] sm:$0xff]  ;;  %v460_v41 = vld [vmem:[%s3639_s15 + $0x60] sm:$0xff]  ;;  %v461_v42 = vld [vmem:[%s3639_s15 + $0x68] sm:$0xff] }
  0x1c   : > { %3304 = vmatmul.mubr.msk.f32.gmra.mxu0 %vm479_vm1, %v450_v13  ;;  %v462_v43 = vld [vmem:[%s3639_s15 + $0x70] sm:$0xff]  ;;  %v463_v44 = vld [vmem:[%s3639_s15 + $0x78] sm:$0xff]  ;;  %v464_v45 = vld [vmem:[%s3639_s15 + $0x80] sm:$0xff] }
  0x1d   : > { %3306 = vmatprep.mubr.msk.f32.mxu0 %vm3520_vm0, %v3519_v1  ;;  %3364 = vmatmul.mubr.msk.f32.gmra.mxu1 %vm479_vm1, %v470_v16  ;;  %v465_v46 = vld [vmem:[%s3639_s15 + $0x88] sm:$0xff]  ;;  %v466_v47 = vld [vmem:[%s3639_s15 + $0x90] sm:$0xff]  ;;  %v467_v48 = vld [vmem:[%s3639_s15 + $0x98] sm:$0xff]  ;;  %s4783_s15 = scalar_lea.vmem %s4876_s11, %s3162_s25 }
  0x1e   : > { %v3782_v5 = vld [vmem:[%s4868_s3] ss:$0 sm:$0xff] }
  0x1f   : > { %813 = vperm.xlu1 %3468, %v760_v14   ;;  %808 = vperm.xlu0 %3467, %v759_v15  }
  0x20   : > { %3307 = vmatmul.mubr.msk.f32.gmra.mxu0 %vm479_vm1, %v451_v17 }
  0x21   : > { %3309 = vmatprep.mubr.msk.f32.mxu0 %vm3520_vm0, %v3519_v1 }
  0x23   : > { %823 = vperm.xlu1 %3468, %v762_v18   ;;  %818 = vperm.xlu0 %3467, %v761_v19  }
  0x24   : > { %3310 = vmatmul.mubr.msk.f32.gmra.mxu0 %vm479_vm1, %v452_v20 }
  0x25   : > { %3312 = vmatprep.mubr.msk.f32.mxu0 %vm3520_vm0, %v3519_v1 }
  0x27   : > { %833 = vperm.xlu1 %3468, %v764_v21   ;;  %828 = vperm.xlu0 %3467, %v763_v22  }
  0x28   : > { %3313 = vmatmul.mubr.msk.f32.gmra.mxu0 %vm479_vm1, %v453_v23 }
  0x29   : > { %3315 = vmatprep.mubr.msk.f32.mxu0 %vm3520_vm0, %v3519_v1 }
  0x2b   : > { %843 = vperm.xlu1 %3468, %v766_v24   ;;  %838 = vperm.xlu0 %3467, %v765_v25  }
  0x2c   : > { %3316 = vmatmul.mubr.msk.f32.gmra.mxu0 %vm479_vm1, %v454_v26 }
  0x2d   : > { %3318 = vmatprep.mubr.msk.f32.mxu0 %vm3520_vm0, %v3519_v1 }
  0x2f   : > { %853 = vperm.xlu1 %3468, %v768_v27   ;;  %848 = vperm.xlu0 %3467, %v767_v28  }
  0x30   : > { %3319 = vmatmul.mubr.msk.f32.gmra.mxu0 %vm479_vm1, %v455_v29 }
  0x31   : > { %3321 = vmatprep.mubr.msk.f32.mxu0 %vm3520_vm0, %v3519_v1 }
  0x33   : > { %863 = vperm.xlu1 %3468, %v770_v30   ;;  %858 = vperm.xlu0 %3467, %v769_v31  }
  0x34   : > { %3322 = vmatmul.mubr.msk.f32.gmra.mxu0 %vm479_vm1, %v456_v32 }
  0x35   : > { %3324 = vmatprep.mubr.msk.f32.mxu0 %vm3520_vm0, %v3519_v1 }
  0x37   : > { %873 = vperm.xlu1 %3468, %v772_v33   ;;  %868 = vperm.xlu0 %3467, %v771_v34  }
  0x38   : > { %3325 = vmatmul.mubr.msk.f32.gmra.mxu0 %vm479_vm1, %v457_v35 }
  0x39   : > { %3327 = vmatprep.mubr.msk.f32.mxu0 %vm3520_vm0, %v3519_v1 }
  0x3b   : > { %883 = vperm.xlu1 %3468, %v774_v36   ;;  %878 = vperm.xlu0 %3467, %v773_v37  }
  0x3c   : > { %3328 = vmatmul.mubr.msk.f32.gmra.mxu0 %vm479_vm1, %v458_v38 }
  0x3d   : > { %3330 = vmatprep.mubr.msk.f32.mxu0 %vm3520_vm0, %v3519_v1 }
  0x3f   : > { %888 = vperm.xlu0 %3467, %v775_v39  }
  0x40   : > { %3331 = vmatmul.mubr.msk.f32.gmra.mxu0 %vm479_vm1, %v459_v40 }
  0x41   : > { %3333 = vmatprep.mubr.msk.f32.mxu0 %vm3520_vm0, %v3519_v1 }
  0x44   : > { %3334 = vmatmul.mubr.msk.f32.gmra.mxu0 %vm479_vm1, %v460_v41 }
  0x45   : > { %3336 = vmatprep.mubr.msk.f32.mxu0 %vm3520_vm0, %v3519_v1 }
  0x48   : > { %3337 = vmatmul.mubr.msk.f32.gmra.mxu0 %vm479_vm1, %v461_v42 }
  0x49   : > { %3339 = vmatprep.mubr.msk.f32.mxu0 %vm3520_vm0, %v3519_v1 }
  0x4c   : > { %3340 = vmatmul.mubr.msk.f32.gmra.mxu0 %vm479_vm1, %v462_v43 }
  0x4d   : > { %3342 = vmatprep.mubr.msk.f32.mxu0 %vm3520_vm0, %v3519_v1 }
  0x50   : > { %3343 = vmatmul.mubr.msk.f32.gmra.mxu0 %vm479_vm1, %v463_v44 }
  0x51   : > { %3345 = vmatprep.mubr.msk.f32.mxu0 %vm3520_vm0, %v3519_v1 }
  0x54   : > { %3346 = vmatmul.mubr.msk.f32.gmra.mxu0 %vm479_vm1, %v464_v45 }
  0x55   : > { %3348 = vmatprep.mubr.msk.f32.mxu0 %vm3520_vm0, %v3519_v1 }
  0x58   : > { %3349 = vmatmul.mubr.msk.f32.gmra.mxu0 %vm479_vm1, %v465_v46 }
  0x59   : > { %3351 = vmatprep.mubr.msk.f32.mxu0 %vm3520_vm0, %v3519_v1 }
  0x5c   : > { %3352 = vmatmul.mubr.msk.f32.gmra.mxu0 %vm479_vm1, %v466_v47 }
  0x5d   : > { %3354 = vmatprep.mubr.msk.f32.mxu0 %vm3520_vm0, %v3519_v1  ;;  %v3522_v1 = vmov 1983009808  }
  0x5e   : > { %v939_v2 = vunpack.c.l.s4 %v3522_v1 }
  0x60   : > { %3355 = vmatmul.mubr.msk.f32.gmra.mxu0 %vm479_vm1, %v467_v48  ;;  %v940_v6 = vunpack.c.0.s8 %v939_v2 }
  0x62   : > { %v3789_v15 = vsub.s32 %v940_v6, %v942_v7 }
  0x8e   : > { %v779_v49 = vpop.permute.xlu0 %778  ;;  %v3749_v50 = vpop.permute.xlu1 %788 }
  0x92   : > { %v784_v51 = vpop.permute.xlu0 %783  ;;  %v3751_v52 = vpop.permute.xlu1 %793 }
  0x96   : > { %v3753_v53 = vpop.permute.xlu0 %798  ;;  %v3755_v54 = vpop.permute.xlu1 %803 }
  0x9a   : > { %v3757_v55 = vpop.permute.xlu0 %808  ;;  %v3759_v56 = vpop.permute.xlu1 %813 }
  0x9e   : > { %v3761_v57 = vpop.permute.xlu0 %818  ;;  %v3763_v58 = vpop.permute.xlu1 %823 }
  0xa2   : > { %v3765_v59 = vpop.permute.xlu0 %828  ;;  %v3767_v60 = vpop.permute.xlu1 %833 }
  0xa6   : > { %v3769_v61 = vpop.permute.xlu0 %838  ;;  %v3771_v62 = vpop.permute.xlu1 %843 }
  0xaa   : > { %v3773_v63 = vpop.permute.xlu0 %848  ;;  %v3775_v0 = vpop.permute.xlu1 %853 }
  0xae   : > { %v3777_v4 = vpop.permute.xlu0 %858  ;;  %v3784_v8 = vpop.permute.xlu1 %863 }
  0xb2   : > { %v3787_v11 = vpop.permute.xlu0 %868  ;;  %v3793_v22 = vpop.permute.xlu1 %873 }
  0xb6   : > { %v879_v29 = vpop.permute.xlu0 %878  ;;  %v884_v44 = vpop.permute.xlu1 %883 }
  0xd4   : > { %v615_v9 = vpop.f32.mrf.mxu0 }
  0xd5   : > { %v616_v10 = vadd.f32 %v3782_v5, %v615_v9  ;;  %v715_v13 = vpop.f32.mrf.mxu1 }
  0xd6   : > { %v3299_v12 = vpop.f32.mrf.mxu0  ;;  %v716_v16 = vadd.f32 %v3782_v5, %v715_v13 }
  0xd7   : > { %v729_v14 = vmax.f32 %v616_v10, 0.0  ;;  %v3359_v18 = vpop.f32.mrf.mxu1 }
  0xd8   : > { %v620_v17 = vpop.f32.mrf.mxu0  ;;  %v749_v21 = vmax.f32 %v716_v16, 0.0 }
  0xd9   : > { %v891_v19 = vmul.f32 %v779_v49, %v729_v14  ;;  %v621_v20 = vadd.f32 %v3782_v5, %v620_v17  ;;  %v720_v24 = vpop.f32.mrf.mxu1 }
  0xda   : > { %v3302_v23 = vpop.f32.mrf.mxu0  ;;  %v721_v28 = vadd.f32 %v3782_v5, %v720_v24  ;;  %v911_v32 = vmul.f32 %v879_v29, %v749_v21 }
  0xdb   : > { %v937_v25 = vcombine.high %v891_v19, %v891_v19  ;;  %v944_v26 = vrot.slane %v891_v19, %v3789_v15  ;;  %v730_v27 = vmax.f32 %v621_v20, 0.0  ;;  %v3362_v31 = vpop.f32.mrf.mxu1 }
  0xdc   : > { %v625_v30 = vpop.f32.mrf.mxu0  ;;  %v750_v38 = vmax.f32 %v721_v28, 0.0  ;;  %v1277_v47 = vcombine.high %v911_v32, %v911_v32  ;;  %v1284_v2 = vrot.slane %v911_v32, %v3789_v15 }
  0xdd   : > { %v951_v33 = vrot.slane %v937_v25, %v3789_v15  ;;  %v952_v34 = vcombine.high %v944_v26, %v944_v26  ;;  %v892_v35 = vmul.f32 %v784_v51, %v730_v27  ;;  %v626_v36 = vadd.f32 %v3782_v5, %v625_v30  ;;  %v3799_v39 = vpop.f32.mrf.mxu1 }
  0xde   : > { %v3305_v37 = vpop.f32.mrf.mxu0  ;;  %v3806_v9 = vmul.f32 %v884_v44, %v750_v38  ;;  %v1291_v20 = vrot.slane %v1277_v47, %v3789_v15  ;;  %v1292_v24 = vcombine.high %v1284_v2, %v1284_v2 }
  0xdf   : > { %v953_v40 = vcombine.high %v951_v33, %v951_v33  ;;  %v1319_v41 = vcombine.low %v944_v26, %v952_v34  ;;  %v954_v42 = vcombine.high %v892_v35, %v892_v35  ;;  %v961_v43 = vrot.slane %v892_v35, %v3789_v15  ;;  %v3365_v48 = vpop.f32.mrf.mxu1 }
  0xe0   : > { %v731_v45 = vmax.f32 %v626_v36, 0.0  ;;  %v630_v46 = vpop.f32.mrf.mxu0  ;;  %v1293_v47 = vcombine.high %v1291_v20, %v1291_v20 }
  0xe1   : > { %v1320_v49 = vcombine.low %v951_v33, %v953_v40  ;;  %v968_v51 = vrot.slane %v954_v42, %v3789_v15  ;;  %v969_v1 = vcombine.high %v961_v43, %v961_v43  ;;  %v631_v6 = vadd.f32 %v3782_v5, %v630_v46 }
  0xe2   : > { %v893_v3 = vmul.f32 %v3749_v50, %v731_v45  ;;  %v3308_v7 = vpop.f32.mrf.mxu0  ;;  %v1327_v10 = vrot.slane %v1319_v41, %v3789_v15  ;;  %v1687_v33 = vrot.slane %v1284_v2, %v3789_v15  ;;  %v3826_v42 = vrot.slane %v3806_v9, %v3789_v15 }
  0xe3   : > { %v1334_v12 = vrot.slane %v1320_v49, %v3789_v15  ;;  %v970_v13 = vcombine.high %v968_v51, %v968_v51  ;;  %v1336_v14 = vcombine.low %v961_v43, %v969_v1  ;;  %v732_v18 = vmax.f32 %v631_v6, 0.0  ;;  %v3836_v1 = vld [vmem:[%s4869_s4] ss:$0 sm:$0xff] }
  0xe4   : > { %v971_v16 = vcombine.high %v893_v3, %v893_v3  ;;  %v978_v17 = vrot.slane %v893_v3, %v3789_v15  ;;  %v635_v19 = vpop.f32.mrf.mxu0  ;;  %1787 = vst.msk [vmem:[#allocation2 + $0xd0] sm:$0x3] %vm1762_vm3, %v1687_v33 }
  0xe5   : > { %v1335_v50 = vcombine.low %v1327_v10, %v1334_v12  ;;  %v1337_v21 = vcombine.low %v968_v51, %v970_v13  ;;  %v636_v23 = vadd.f32 %v3782_v5, %v635_v19  ;;  %v894_v28 = vmul.f32 %v3751_v52, %v732_v18 }
  0xe6   : > { %v985_v25 = vrot.slane %v971_v16, %v3789_v15  ;;  %v986_v26 = vcombine.high %v978_v17, %v978_v17  ;;  %v1359_v27 = vrot.slane %v978_v17, %v3789_v15  ;;  %v3311_v29 = vpop.f32.mrf.mxu0  ;;  %v1344_v30 = vrot.slane %v1336_v14, %v3789_v15 }
  0xe7   : > { %1760 = vst.msk [vmem:[#allocation2] sm:$0xff] %vm1759_vm2, %v1335_v50  ;;  %v1351_v31 = vrot.slane %v1337_v21, %v3789_v15  ;;  %v733_v32 = vmax.f32 %v636_v23, 0.0  ;;  %v988_v36 = vcombine.high %v894_v28, %v894_v28  ;;  %v995_v37 = vrot.slane %v894_v28, %v3789_v15 }
  0xe8   : > { %v1360_v34 = vcombine.low %v986_v26, %v985_v25  ;;  %1763 = vst.msk [vmem:[#allocation2 + $0x10] sm:$0x3] %vm1762_vm3, %v1359_v27  ;;  %v987_v35 = vcombine.high %v985_v25, %v985_v25  ;;  %v640_v38 = vpop.f32.mrf.mxu0  ;;  %v1688_v10 = vcombine.low %v1292_v24, %v1291_v20  ;;  %v1689_v21 = vcombine.low %v1293_v47, %v3826_v42 }
  0xe9   : > { %v1352_v40 = vcombine.low %v1344_v30, %v1351_v31  ;;  %v895_v52 = vmul.f32 %v3753_v53, %v733_v32  ;;  %v641_v41 = vadd.f32 %v3782_v5, %v640_v38  ;;  %v1002_v43 = vrot.slane %v988_v36, %v3789_v15 }
  0xea   : > { %v1003_v44 = vcombine.high %v995_v37, %v995_v37  ;;  %v1361_v45 = vcombine.low %v987_v35, %v995_v37  ;;  %v3314_v46 = vpop.f32.mrf.mxu0  ;;  %v1368_v48 = vrot.slane %v1360_v34, %v3789_v15  ;;  %v1696_v32 = vrot.slane %v1688_v10, %v3789_v15 }
  0xeb   : > { %1761 = vst.msk [vmem:[#allocation2 + $0x8] sm:$0xff] %vm1759_vm2, %v1352_v40  ;;  %v1005_v49 = vcombine.high %v895_v52, %v895_v52  ;;  %v1012_v53 = vrot.slane %v895_v52, %v3789_v15  ;;  %v734_v51 = vmax.f32 %v641_v41, 0.0  ;;  %v1004_v6 = vcombine.high %v1002_v43, %v1002_v43 }
  0xec   : > { %v1375_v2 = vrot.slane %v1361_v45, %v3789_v15  ;;  %v1377_v3 = vcombine.low %v1003_v44, %v1002_v43  ;;  %v645_v7 = vpop.f32.mrf.mxu0  ;;  %v1703_v33 = vrot.slane %v1689_v21, %v3789_v15  ;;  %v3860_v43 = vld [vmem:[%s4869_s4 + $0x1] ss:$0 sm:$0xff]  ;;  %v726_v47 = vadd.f32 %v3782_v5, %v3799_v39 }
  0xed   : > { %v1019_v12 = vrot.slane %v1005_v49, %v3789_v15  ;;  %v1020_v13 = vcombine.high %v1012_v53, %v1012_v53  ;;  %v896_v14 = vmul.f32 %v3755_v54, %v734_v51  ;;  %v646_v16 = vadd.f32 %v3782_v5, %v645_v7 }
  0xee   : > { %v1791_v17 = vld [vmem:[#allocation2] sm:$0xff]  ;;  %v1376_v18 = vcombine.low %v1368_v48, %v1375_v2  ;;  %v1378_v19 = vcombine.low %v1004_v6, %v1012_v53  ;;  %v3317_v50 = vpop.f32.mrf.mxu0  ;;  %v1385_v20 = vrot.slane %v1377_v3, %v3789_v15  ;;  %v1704_v53 = vcombine.low %v1696_v32, %v1703_v33 }
  0xef   : > { %v1812_v23 = vmul.f32 %v3836_v1, %v1791_v17  ;;  %v1021_v25 = vcombine.high %v1019_v12, %v1019_v12  ;;  %v1400_v26 = vrot.slane %v1020_v13, %v3789_v15  ;;  %v1022_v27 = vcombine.high %v896_v14, %v896_v14 }
  0xf0   : > { %1764 = vst.msk [vmem:[#allocation2 + $0x18] sm:$0xff] %vm1759_vm2, %v1376_v18  ;;  %v1392_v54 = vrot.slane %v1378_v19, %v3789_v15  ;;  %v1029_v24 = vrot.slane %v896_v14, %v3789_v15  ;;  %v735_v28 = vmax.f32 %v646_v16, 0.0  ;;  %v650_v29 = vpop.f32.mrf.mxu0  ;;  %v1294_v6 = vcombine.high %v3806_v9, %v3806_v9  ;;  %1788 = vst.msk [vmem:[#allocation2 + $0xd8] sm:$0xff] %vm1759_vm2, %v1704_v53 }
  0xf1   : > { %1828 = vst.msk [vmem:[#allocation3] sm:$0xff] %vm1759_vm2, %v1812_v23  ;;  %v1036_v30 = vrot.slane %v1022_v27, %v3789_v15  ;;  %v651_v31 = vadd.f32 %v3782_v5, %v650_v29  ;;  %v1401_v36 = vcombine.low %v1019_v12, %v1021_v25  ;;  %v751_v9 = vmax.f32 %v726_v47, 0.0  ;;  %v889_v27 = vpop.permute.xlu0 %888  ;;  %v3910_v47 = vld [vmem:[%s4869_s4 + $0x2] ss:$0 sm:$0xff] }
  0xf2   : > { %1766 = vst.msk [vmem:[#allocation2 + $0x28] sm:$0x3] %vm1762_vm3, %v1400_v26  ;;  %v1792_v34 = vld [vmem:[#allocation2 + $0x8] sm:$0xff]  ;;  %v1393_v35 = vcombine.low %v1385_v20, %v1392_v54  ;;  %v1037_v37 = vcombine.high %v1029_v24, %v1029_v24  ;;  %v897_v38 = vmul.f32 %v3757_v55, %v735_v28  ;;  %v3320_v40 = vpop.f32.mrf.mxu0 }
  0xf3   : > { %v1813_v52 = vmul.f32 %v3836_v1, %v1792_v34  ;;  %v1844_v41 = vld [vmem:[#allocation2 + $0x1] sm:$0xff]  ;;  %v1038_v44 = vcombine.high %v1036_v30, %v1036_v30  ;;  %v736_v49 = vmax.f32 %v651_v31, 0.0  ;;  %v1409_v2 = vrot.slane %v1401_v36, %v3789_v15  ;;  %v1845_v10 = vld [vmem:[#allocation2 + $0x9] sm:$0xff] }
  0xf4   : > { %1765 = vst.msk [vmem:[#allocation2 + $0x20] sm:$0xff] %vm1759_vm2, %v1393_v35  ;;  %v1402_v45 = vcombine.low %v1029_v24, %v1037_v37  ;;  %v655_v46 = vpop.f32.mrf.mxu0  ;;  %v1039_v55 = vcombine.high %v897_v38, %v897_v38  ;;  %v1046_v48 = vrot.slane %v897_v38, %v3789_v15  ;;  %v1865_v51 = vmul.f32 %v3860_v43, %v1844_v41 }
  0xf5   : > { %1829 = vst.msk [vmem:[#allocation3 + $0x8] sm:$0xff] %vm1759_vm2, %v1813_v52  ;;  %v1418_v39 = vcombine.low %v1036_v30, %v1038_v44  ;;  %v898_v16 = vmul.f32 %v3759_v56, %v736_v49  ;;  %v656_v50 = vadd.f32 %v3782_v5, %v655_v46  ;;  %v1866_v20 = vmul.f32 %v3860_v43, %v1845_v10  ;;  %v2582_v44 = vld [vmem:[%s4871_s6 + $0x8] sm:$0xff] }
  0xf6   : > { %v1416_v3 = vrot.slane %v1402_v45, %v3789_v15  ;;  %v3323_v7 = vpop.f32.mrf.mxu0  ;;  %v1053_v13 = vrot.slane %v1039_v55, %v3789_v15  ;;  %v1054_v14 = vcombine.high %v1046_v48, %v1046_v48  ;;  %v3885_v56 = vrot.slane %v1294_v6, %v3789_v15  ;;  %v2581_v45 = vld [vmem:[%s4871_s6] sm:$0xff]  ;;  %3366 = vmatprep.subr.mxu1 %v2582_v44 }
  0xf7   : > { %v3872_v12 = vld [vmem:[#allocation2 + $0x18] sm:$0xff]  ;;  %v1056_v30 = vcombine.high %v898_v16, %v898_v16  ;;  %v1063_v31 = vrot.slane %v898_v16, %v3789_v15  ;;  %v1426_v34 = vrot.slane %v1418_v39, %v3789_v15  ;;  %v737_v35 = vmax.f32 %v656_v50, 0.0  ;;  %v1929_v46 = vld [vmem:[#allocation2 + $0x2] sm:$0xff]  ;;  %3367 = vmatpush3.msra.mxu1 %v2582_v44 }
  0xf8   : > { %v1881_v17 = vld [vmem:[#allocation3] sm:$0xff]  ;;  %v1814_v18 = vmul.f32 %v3836_v1, %v3872_v12  ;;  %v1417_v19 = vcombine.low %v1409_v2, %v1416_v3  ;;  %v660_v21 = vpop.f32.mrf.mxu0  ;;  %v1419_v25 = vcombine.low %v1046_v48, %v1054_v14  ;;  %v1441_v26 = vrot.slane %v1053_v13, %v3789_v15  ;;  %3368 = vmatprep.subr.mxu1 %v2581_v45 }
  0xf9   : > { %v1897_v23 = vadd.f32 %v1881_v17, %v1865_v51  ;;  %v1055_v29 = vcombine.high %v1053_v13, %v1053_v13  ;;  %v913_v36 = vmul.f32 %v889_v27, %v751_v9  ;;  %v1309_v52 = vcombine.high %v3826_v42, %v3826_v42  ;;  %v1930_v51 = vld [vmem:[#allocation2 + $0xa] sm:$0xff]  ;;  %3369 = vmatpush3.msra.mxu1 %v2581_v45 }
  0xfa   : > { %1830 = vst.msk [vmem:[#allocation3 + $0x10] sm:$0xff] %vm1759_vm2, %v1814_v18  ;;  %1767 = vst.msk [vmem:[#allocation2 + $0x30] sm:$0xff] %vm1759_vm2, %v1417_v19  ;;  %v3326_v54 = vpop.f32.mrf.mxu0  ;;  %v1433_v28 = vrot.slane %v1419_v25, %v3789_v15  ;;  %v661_v41 = vadd.f32 %v3782_v5, %v660_v21  ;;  %v1070_v48 = vrot.slane %v1056_v30, %v3789_v15 }
  0xfb   : > { %1913 = vst.msk [vmem:[#allocation3] sm:$0xff] %vm1759_vm2, %v1897_v23  ;;  %v3888_v24 = vld [vmem:[#allocation2 + $0x20] sm:$0xff]  ;;  %v1071_v49 = vcombine.high %v1063_v31, %v1063_v31  ;;  %v1442_v53 = vcombine.low %v1055_v29, %v1063_v31  ;;  %v899_v3 = vmul.f32 %v3761_v57, %v737_v35  ;;  %v1310_v6 = vcombine.high %v3885_v56, %v3885_v56 }
  0xfc   : > { %1769 = vst.msk [vmem:[#allocation2 + $0x40] sm:$0x3] %vm1762_vm3, %v1441_v26  ;;  %v1882_v32 = vld [vmem:[#allocation3 + $0x8] sm:$0xff]  ;;  %v1815_v33 = vmul.f32 %v3836_v1, %v3888_v24  ;;  %v665_v37 = vpop.f32.mrf.mxu0  ;;  %v1434_v55 = vcombine.low %v1426_v34, %v1433_v28  ;;  %v1317_v7 = vrot.slane %v913_v36, %v3789_v15  ;;  %v1950_v39 = vmul.f32 %v3910_v47, %v1929_v46  ;;  %v3923_v13 = vld [vmem:[#allocation2 + $0x21] sm:$0xff] }
  0xfd   : > { %v1898_v38 = vadd.f32 %v1882_v32, %v1866_v20  ;;  %v3896_v40 = vld [vmem:[#allocation2 + $0x19] sm:$0xff]  ;;  %v1443_v17 = vcombine.low %v1071_v49, %v1070_v48  ;;  %v3928_v18 = vcombine.low %v1309_v52, %v3885_v56  ;;  %v738_v19 = vmax.f32 %v661_v41, 0.0 }
  0xfe   : > { %1831 = vst.msk [vmem:[#allocation3 + $0x18] sm:$0xff] %vm1759_vm2, %v1815_v33  ;;  %v3329_v42 = vpop.f32.mrf.mxu0  ;;  %v1867_v2 = vmul.f32 %v3860_v43, %v3896_v40  ;;  %1768 = vst.msk [vmem:[#allocation2 + $0x38] sm:$0xff] %vm1759_vm2, %v1434_v55  ;;  %v1450_v21 = vrot.slane %v1442_v53, %v3789_v15  ;;  %v1072_v23 = vcombine.high %v1070_v48, %v1070_v48  ;;  %v3945_v55 = vld [vmem:[#allocation2 + $0x1a] sm:$0xff] }
  0xff   : > { %1914 = vst.msk [vmem:[#allocation3 + $0x8] sm:$0xff] %vm1759_vm2, %v1898_v38  ;;  %v1457_v27 = vrot.slane %v1443_v17, %v3789_v15  ;;  %v1073_v20 = vcombine.high %v899_v3, %v899_v3  ;;  %v1080_v54 = vrot.slane %v899_v3, %v3789_v15  ;;  %v1951_v56 = vmul.f32 %v3910_v47, %v1930_v51 }
 0x100   : > { %v670_v10 = vpop.f32.mrf.mxu0  ;;  %v1868_v28 = vmul.f32 %v3860_v43, %v3923_v13  ;;  %v1318_v29 = vcombine.high %v1317_v7, %v1317_v7  ;;  %v1706_v30 = vcombine.low %v1310_v6, %v1317_v7  ;;  %v900_v36 = vmul.f32 %v3763_v58, %v738_v19  ;;  %v3955_v58 = vld [vmem:[%s4869_s4 + $0x3] ss:$0 sm:$0xff] }
 0x101   : > { %v1883_v14 = vld [vmem:[#allocation3 + $0x10] sm:$0xff]  ;;  %v3925_v16 = vld [vmem:[#allocation2 + $0x30] sm:$0xff]  ;;  %v1458_v33 = vcombine.low %v1450_v21, %v1457_v27  ;;  %v1087_v34 = vrot.slane %v1073_v20, %v3789_v15  ;;  %v1088_v35 = vcombine.high %v1080_v54, %v1080_v54  ;;  %v666_v44 = vadd.f32 %v3782_v5, %v665_v37 }
 0x102   : > { %v1966_v57 = vld [vmem:[#allocation3] sm:$0xff]  ;;  %v1899_v50 = vadd.f32 %v1883_v14, %v1867_v2  ;;  %v1816_v9 = vmul.f32 %v3836_v1, %v3925_v16  ;;  %v3332_v25 = vpop.f32.mrf.mxu0  ;;  %v1728_v41 = vrot.slane %v1318_v29, %v3789_v15  ;;  %v1459_v49 = vcombine.low %v1072_v23, %v1080_v54 }
 0x103   : > { %v1982_v26 = vadd.f32 %v1966_v57, %v1950_v39  ;;  %1770 = vst.msk [vmem:[#allocation2 + $0x48] sm:$0xff] %vm1759_vm2, %v1458_v33  ;;  %v1460_v53 = vcombine.low %v1088_v35, %v1087_v34  ;;  %v1713_v51 = vrot.slane %v3928_v18, %v3789_v15  ;;  %v1089_v2 = vcombine.high %v1087_v34, %v1087_v34 }
 0x104   : > { %1915 = vst.msk [vmem:[#allocation3 + $0x10] sm:$0xff] %vm1759_vm2, %v1899_v50  ;;  %1832 = vst.msk [vmem:[#allocation3 + $0x20] sm:$0xff] %vm1759_vm2, %v1816_v9  ;;  %v675_v31 = vpop.f32.mrf.mxu0  ;;  %v1720_v3 = vrot.slane %v1706_v30, %v3789_v15  ;;  %v1090_v7 = vcombine.high %v900_v36, %v900_v36  ;;  %v1952_v39 = vmul.f32 %v3910_v47, %v3945_v55  ;;  %v739_v17 = vmax.f32 %v666_v44, 0.0  ;;  %v3975_v50 = vld [vmem:[#allocation2 + $0x22] sm:$0xff] }
 0x105   : > { %1998 = vst.msk [vmem:[#allocation3] sm:$0xff] %vm1759_vm2, %v1982_v26  ;;  %v1884_v32 = vld [vmem:[#allocation3 + $0x18] sm:$0xff]  ;;  %v3947_v42 = vld [vmem:[#allocation2 + $0x38] sm:$0xff]  ;;  %v671_v18 = vadd.f32 %v3782_v5, %v670_v10  ;;  %v2036_v57 = vmul.f32 %v3955_v58, %v3872_v12  ;;  %v1467_v23 = vrot.slane %v1459_v49, %v3789_v15  ;;  %v1474_v25 = vrot.slane %v1460_v53, %v3789_v15 }
 0x106   : > { %v1967_v38 = vld [vmem:[#allocation3 + $0x8] sm:$0xff]  ;;  %v1900_v52 = vadd.f32 %v1884_v32, %v1868_v28  ;;  %v3335_v45 = vpop.f32.mrf.mxu0  ;;  %v1817_v37 = vmul.f32 %v3836_v1, %v3947_v42  ;;  %1790 = vst.msk [vmem:[#allocation2 + $0xe8] sm:$0x3] %vm1762_vm3, %v1728_v41  ;;  %v1482_v54 = vrot.slane %v1089_v2, %v3789_v15  ;;  %v1097_v30 = vrot.slane %v900_v36, %v3789_v15 }
 0x107   : > { %v1983_v46 = vadd.f32 %v1967_v38, %v1951_v56  ;;  %v3949_v48 = vld [vmem:[#allocation2 + $0x31] sm:$0xff]  ;;  %v1721_v56 = vcombine.low %v1713_v51, %v1720_v3  ;;  %v3982_v29 = vld [vmem:[#allocation2 + $0x39] sm:$0xff]  ;;  %v1475_v12 = vcombine.low %v1467_v23, %v1474_v25  ;;  %v1104_v32 = vrot.slane %v1090_v7, %v3789_v15 }
 0x108   : > { %1916 = vst.msk [vmem:[#allocation3 + $0x18] sm:$0xff] %vm1759_vm2, %v1900_v52  ;;  %v3964_v6 = vpop.f32.mrf.mxu0  ;;  %1833 = vst.msk [vmem:[#allocation3 + $0x28] sm:$0xff] %vm1759_vm2, %v1817_v37  ;;  %v1869_v14 = vmul.f32 %v3860_v43, %v3949_v48  ;;  %v1953_v33 = vmul.f32 %v3910_v47, %v3975_v50  ;;  %v901_v35 = vmul.f32 %v3765_v59, %v739_v17  ;;  %v740_v38 = vmax.f32 %v671_v18, 0.0  ;;  %v4005_v59 = vld [vmem:[%s4869_s4 + $0x4] ss:$0 sm:$0xff]  ;;  %v4011_v3 = vld [vmem:[#allocation2 + $0x32] sm:$0xff] }
 0x109   : > { %1999 = vst.msk [vmem:[#allocation3 + $0x8] sm:$0xff] %vm1759_vm2, %v1983_v46  ;;  %1789 = vst.msk [vmem:[#allocation2 + $0xe0] sm:$0xff] %vm1759_vm2, %v1721_v56  ;;  %v676_v36 = vadd.f32 %v3782_v5, %v675_v31  ;;  %v2037_v44 = vmul.f32 %v3955_v58, %v3888_v24  ;;  %v1105_v46 = vcombine.high %v1097_v30, %v1097_v30  ;;  %v4018_v17 = vld [vmem:[%s4873_s8] sm:$0xff] }
 0x10a   : > { %v3338_v19 = vpop.f32.mrf.mxu0  ;;  %v3990_v34 = vld [vmem:[#allocation2 + $0x48] sm:$0xff]  ;;  %1772 = vst.msk [vmem:[#allocation2 + $0x58] sm:$0x3] %vm1762_vm3, %v1482_v54  ;;  %v1870_v31 = vmul.f32 %v3860_v43, %v3982_v29  ;;  %v1106_v37 = vcombine.high %v1104_v32, %v1104_v32  ;;  %3394 = vmatprep.subr.mxu1 %v4018_v17  ;;  %v2038_v25 = vmul.f32 %v3955_v58, %v3925_v16  ;;  %v4038_v56 = vld [vmem:[#allocation2 + $0x3a] sm:$0xff] }
 0x10b   : > { %v1968_v9 = vld [vmem:[#allocation3 + $0x10] sm:$0xff]  ;;  %v1885_v21 = vld [vmem:[#allocation3 + $0x20] sm:$0xff]  ;;  %v1818_v45 = vmul.f32 %v3836_v1, %v3990_v34  ;;  %1771 = vst.msk [vmem:[#allocation2 + $0x50] sm:$0xff] %vm1759_vm2, %v1475_v12  ;;  %v1483_v7 = vcombine.low %v1097_v30, %v1105_v46 }
 0x10c   : > { %v2052_v26 = vld [vmem:[#allocation3] sm:$0xff]  ;;  %v1984_v27 = vadd.f32 %v1968_v9, %v1952_v39  ;;  %v1901_v20 = vadd.f32 %v1885_v21, %v1869_v14  ;;  %v3980_v28 = vpop.f32.mrf.mxu0  ;;  %v1107_v39 = vcombine.high %v901_v35, %v901_v35  ;;  %v902_v14 = vmul.f32 %v3767_v60, %v740_v38 }
 0x10d   : > { %v2068_v10 = vadd.f32 %v2052_v26, %v2036_v57  ;;  %1834 = vst.msk [vmem:[#allocation3 + $0x30] sm:$0xff] %vm1759_vm2, %v1818_v45  ;;  %v1484_v19 = vcombine.low %v1104_v32, %v1106_v37  ;;  %v741_v57 = vmax.f32 %v676_v36, 0.0  ;;  %v2121_v21 = vmul.f32 %v4005_v59, %v3896_v40 }
 0x10e   : > { %2000 = vst.msk [vmem:[#allocation3 + $0x10] sm:$0xff] %vm1759_vm2, %v1984_v27  ;;  %1917 = vst.msk [vmem:[#allocation3 + $0x20] sm:$0xff] %vm1759_vm2, %v1901_v20  ;;  %v3341_v52 = vpop.f32.mrf.mxu0  ;;  %v1114_v60 = vrot.slane %v901_v35, %v3789_v15  ;;  %v4027_v23 = vrot.slane %v902_v14, %v3789_v15  ;;  %v1954_v26 = vmul.f32 %v3910_v47, %v4011_v3 }
 0x10f   : > { %2084 = vst.msk [vmem:[#allocation3] sm:$0xff] %vm1759_vm2, %v2068_v10  ;;  %v1969_v41 = vld [vmem:[#allocation3 + $0x18] sm:$0xff]  ;;  %v1886_v2 = vld [vmem:[#allocation3 + $0x28] sm:$0xff]  ;;  %v1491_v27 = vrot.slane %v1483_v7, %v3789_v15  ;;  %v1498_v20 = vrot.slane %v1484_v19, %v3789_v15  ;;  %v1121_v12 = vrot.slane %v1107_v39, %v3789_v15  ;;  %v1124_v30 = vcombine.high %v902_v14, %v902_v14  ;;  %v4073_v39 = vld [vmem:[%s4869_s4 + $0x6] ss:$0 sm:$0xff] }
 0x110   : > { %v1985_v49 = vadd.f32 %v1969_v41, %v1953_v33  ;;  %v2053_v53 = vld [vmem:[#allocation3 + $0x8] sm:$0xff]  ;;  %v4009_v51 = vpop.f32.mrf.mxu0  ;;  %v1902_v18 = vadd.f32 %v1886_v2, %v1870_v31  ;;  %v1523_v32 = vrot.slane %v4027_v23, %v3789_v15  ;;  %v681_v33 = vadd.f32 %v3782_v5, %v3964_v6  ;;  %v4058_v6 = vld [vmem:[%s4869_s4 + $0x5] ss:$0 sm:$0xff] }
 0x111   : > { %v2069_v24 = vadd.f32 %v2053_v53, %v2037_v44  ;;  %v1499_v44 = vcombine.low %v1491_v27, %v1498_v20  ;;  %v903_v45 = vmul.f32 %v3769_v61, %v741_v57  ;;  %v1122_v37 = vcombine.high %v1114_v60, %v1114_v60 }
 0x112   : > { %2001 = vst.msk [vmem:[#allocation3 + $0x18] sm:$0xff] %vm1759_vm2, %v1985_v49  ;;  %v3344_v9 = vpop.f32.mrf.mxu0  ;;  %1918 = vst.msk [vmem:[#allocation3 + $0x28] sm:$0xff] %vm1759_vm2, %v1902_v18  ;;  %v4045_v52 = vld [vmem:[#allocation2 + $0x50] sm:$0xff]  ;;  %v2039_v61 = vmul.f32 %v3955_v58, %v3947_v42  ;;  %v2122_v7 = vmul.f32 %v4005_v59, %v3923_v13  ;;  %v1955_v14 = vmul.f32 %v3910_v47, %v4038_v56 }
 0x113   : > { %2085 = vst.msk [vmem:[#allocation3 + $0x8] sm:$0xff] %vm1759_vm2, %v2069_v24  ;;  %v4047_v41 = vld [vmem:[#allocation2 + $0x49] sm:$0xff]  ;;  %v1819_v53 = vmul.f32 %v3836_v1, %v4045_v52  ;;  %1773 = vst.msk [vmem:[#allocation2 + $0x60] sm:$0xff] %vm1759_vm2, %v1499_v44  ;;  %v1123_v57 = vcombine.high %v1121_v12, %v1121_v12  ;;  %v1141_v13 = vcombine.high %v903_v45, %v903_v45 }
 0x114   : > { %v4036_v54 = vpop.f32.mrf.mxu0  ;;  %v1871_v31 = vmul.f32 %v3860_v43, %v4047_v41  ;;  %1775 = vst.msk [vmem:[#allocation2 + $0x70] sm:$0x3] %vm1762_vm3, %v1523_v32  ;;  %v1887_v24 = vld [vmem:[#allocation3 + $0x30] sm:$0xff]  ;;  %v2040_v44 = vmul.f32 %v3955_v58, %v3990_v34 }
 0x115   : > { %v2054_v40 = vld [vmem:[#allocation3 + $0x10] sm:$0xff]  ;;  %v1970_v10 = vld [vmem:[#allocation3 + $0x20] sm:$0xff]  ;;  %1835 = vst.msk [vmem:[#allocation3 + $0x38] sm:$0xff] %vm1759_vm2, %v1819_v53  ;;  %v1148_v53 = vrot.slane %v903_v45, %v3789_v15 }
 0x116   : > { %v2137_v35 = vld [vmem:[#allocation3] sm:$0xff]  ;;  %v2070_v38 = vadd.f32 %v2054_v40, %v2038_v25  ;;  %v1986_v36 = vadd.f32 %v1970_v10, %v1954_v26  ;;  %v3347_v46 = vpop.f32.mrf.mxu0  ;;  %v1903_v19 = vadd.f32 %v1887_v24, %v1871_v31  ;;  %v1138_v25 = vrot.slane %v1124_v30, %v3789_v15 }
 0x117   : > { %v2153_v49 = vadd.f32 %v2137_v35, %v2121_v21  ;;  %v742_v26 = vmax.f32 %v681_v33, 0.0  ;;  %v2206_v40 = vmul.f32 %v4058_v6, %v3945_v55  ;;  %v4083_v10 = vmul.f32 %v4058_v6, %v3975_v50 }
 0x118   : > { %2086 = vst.msk [vmem:[#allocation3 + $0x10] sm:$0xff] %vm1759_vm2, %v2070_v38  ;;  %2002 = vst.msk [vmem:[#allocation3 + $0x20] sm:$0xff] %vm1759_vm2, %v1986_v36  ;;  %v4065_v2 = vpop.f32.mrf.mxu0  ;;  %v1500_v35 = vcombine.low %v1114_v60, %v1122_v37  ;;  %v4088_v38 = vmul.f32 %v4073_v39, %v3925_v16  ;;  %v2123_v33 = vmul.f32 %v4005_v59, %v3949_v48  ;;  %v4093_v36 = vld [vmem:[#allocation2 + $0x51] sm:$0xff] }
 0x119   : > { %2169 = vst.msk [vmem:[#allocation3] sm:$0xff] %vm1759_vm2, %v2153_v49  ;;  %v2055_v18 = vld [vmem:[#allocation3 + $0x18] sm:$0xff]  ;;  %v1971_v32 = vld [vmem:[#allocation3 + $0x28] sm:$0xff]  ;;  %1919 = vst.msk [vmem:[#allocation3 + $0x30] sm:$0xff] %vm1759_vm2, %v1903_v19  ;;  %v1139_v55 = vcombine.high %v4027_v23, %v4027_v23  ;;  %v2124_v60 = vmul.f32 %v4005_v59, %v3982_v29  ;;  %v4104_v16 = vmul.f32 %v4058_v6, %v4011_v3 }
 0x11a   : > { %v2138_v9 = vld [vmem:[#allocation3 + $0x8] sm:$0xff]  ;;  %v2071_v21 = vadd.f32 %v2055_v18, %v2039_v61  ;;  %v3350_v27 = vpop.f32.mrf.mxu0  ;;  %v1987_v30 = vadd.f32 %v1971_v32, %v1955_v14  ;;  %v1501_v46 = vcombine.low %v1121_v12, %v1123_v57  ;;  %v4109_v49 = vld [vmem:[#allocation2 + $0x4a] sm:$0xff]  ;;  %v1140_v23 = vcombine.high %v1138_v25, %v1138_v25  ;;  %v4116_v18 = vld [vmem:[#allocation2 + $0x60] sm:$0xff] }
 0x11b   : > { %v2154_v20 = vadd.f32 %v2138_v9, %v2122_v7  ;;  %v1155_v31 = vrot.slane %v1141_v13, %v3789_v15  ;;  %v904_v37 = vmul.f32 %v3771_v62, %v742_v26  ;;  %v1872_v14 = vmul.f32 %v3860_v43, %v4093_v36 }
 0x11c   : > { %2087 = vst.msk [vmem:[#allocation3 + $0x18] sm:$0xff] %vm1759_vm2, %v2071_v21  ;;  %v4097_v50 = vpop.f32.mrf.mxu0  ;;  %2003 = vst.msk [vmem:[#allocation3 + $0x28] sm:$0xff] %vm1759_vm2, %v1987_v30  ;;  %v1508_v12 = vrot.slane %v1500_v35, %v3789_v15  ;;  %v1515_v19 = vrot.slane %v1501_v46, %v3789_v15  ;;  %v686_v57 = vadd.f32 %v3782_v5, %v3980_v28  ;;  %v1888_v13 = vld [vmem:[#allocation3 + $0x38] sm:$0xff] }
 0x11d   : > { %2170 = vst.msk [vmem:[#allocation3 + $0x8] sm:$0xff] %vm1759_vm2, %v2154_v20  ;;  %v1820_v62 = vmul.f32 %v3836_v1, %v4116_v18  ;;  %v1524_v26 = vcombine.low %v1139_v55, %v1138_v25  ;;  %v1904_v32 = vadd.f32 %v1888_v13, %v1872_v14  ;;  %v1956_v35 = vmul.f32 %v3910_v47, %v4109_v49 }
 0x11e   : > { %v3353_v61 = vpop.f32.mrf.mxu0  ;;  %v1516_v30 = vcombine.low %v1508_v12, %v1515_v19  ;;  %v1157_v46 = vcombine.high %v1155_v31, %v1155_v31  ;;  %v743_v14 = vmax.f32 %v686_v57, 0.0  ;;  %v4156_v57 = vld [vmem:[#allocation2 + $0x52] sm:$0xff] }
 0x11f   : > { %v2139_v24 = vld [vmem:[#allocation3 + $0x10] sm:$0xff]  ;;  %v2056_v7 = vld [vmem:[#allocation3 + $0x20] sm:$0xff]  ;;  %1836 = vst.msk [vmem:[#allocation3 + $0x40] sm:$0xff] %vm1759_vm2, %v1820_v62  ;;  %v1158_v61 = vcombine.high %v904_v37, %v904_v37  ;;  %1920 = vst.msk [vmem:[#allocation3 + $0x38] sm:$0xff] %vm1759_vm2, %v1904_v32 }
 0x120   : > { %v2222_v45 = vld [vmem:[#allocation3] sm:$0xff]  ;;  %v2155_v9 = vadd.f32 %v2139_v24, %v2123_v33  ;;  %v2072_v21 = vadd.f32 %v2056_v7, %v2040_v44  ;;  %v4124_v27 = vpop.f32.mrf.mxu0  ;;  %v1972_v28 = vld [vmem:[#allocation3 + $0x30] sm:$0xff]  ;;  %v1156_v33 = vcombine.high %v1148_v53, %v1148_v53  ;;  %v1525_v44 = vcombine.low %v1140_v23, %v1148_v53  ;;  %1774 = vst.msk [vmem:[#allocation2 + $0x68] sm:$0xff] %vm1759_vm2, %v1516_v30 }
 0x121   : > { %v2238_v20 = vadd.f32 %v2222_v45, %v2206_v40  ;;  %v1988_v55 = vadd.f32 %v1972_v28, %v1956_v35  ;;  %v2041_v24 = vmul.f32 %v3955_v58, %v4045_v52  ;;  %v1165_v7 = vrot.slane %v904_v37, %v3789_v15 }
 0x122   : > { %2171 = vst.msk [vmem:[#allocation3 + $0x10] sm:$0xff] %vm1759_vm2, %v2155_v9  ;;  %2088 = vst.msk [vmem:[#allocation3 + $0x20] sm:$0xff] %vm1759_vm2, %v2072_v21  ;;  %v3356_v25 = vpop.f32.mrf.mxu0  ;;  %v1532_v23 = vrot.slane %v1524_v26, %v3789_v15  ;;  %v1539_v53 = vrot.slane %v1525_v44, %v3789_v15  ;;  %v1541_v45 = vcombine.low %v1156_v33, %v1155_v31  ;;  %v4143_v21 = vld [vmem:[%s4869_s4 + $0x7] ss:$0 sm:$0xff] }
 0x123   : > { %2254 = vst.msk [vmem:[#allocation3] sm:$0xff] %vm1759_vm2, %v2238_v20  ;;  %v2140_v40 = vld [vmem:[#allocation3 + $0x18] sm:$0xff]  ;;  %2004 = vst.msk [vmem:[#allocation3 + $0x30] sm:$0xff] %vm1759_vm2, %v1988_v55  ;;  %v2057_v13 = vld [vmem:[#allocation3 + $0x28] sm:$0xff]  ;;  %v1173_v62 = vcombine.high %v1165_v7, %v1165_v7  ;;  %v1542_v37 = vcombine.low %v1157_v46, %v1165_v7  ;;  %v2209_v31 = vmul.f32 %v4058_v6, %v4038_v56 }
 0x124   : > { %v2223_v12 = vld [vmem:[#allocation3 + $0x8] sm:$0xff]  ;;  %v2156_v19 = vadd.f32 %v2140_v40, %v2124_v60  ;;  %v691_v60 = vadd.f32 %v3782_v5, %v4009_v51  ;;  %v2073_v26 = vadd.f32 %v2057_v13, %v2041_v24  ;;  %v1540_v20 = vcombine.low %v1532_v23, %v1539_v53 }
 0x125   : > { %v2239_v9 = vadd.f32 %v2223_v12, %v4083_v10  ;;  %v4154_v10 = vld [vmem:[%s4869_s4 + $0x8] ss:$0 sm:$0xff]  ;;  %v1172_v32 = vrot.slane %v1158_v61, %v3789_v15  ;;  %v1549_v51 = vrot.slane %v1541_v45, %v3789_v15  ;;  %v1556_v35 = vrot.slane %v1542_v37, %v3789_v15 }
 0x126   : > { %2172 = vst.msk [vmem:[#allocation3 + $0x18] sm:$0xff] %vm1759_vm2, %v2156_v19  ;;  %v1564_v30 = vrot.slane %v1173_v62, %v3789_v15  ;;  %v905_v28 = vmul.f32 %v3773_v63, %v743_v14  ;;  %v2293_v33 = vmul.f32 %v4073_v39, %v3947_v42  ;;  %v4168_v44 = vmul.f32 %v4143_v21, %v3949_v48  ;;  %v1973_v7 = vld [vmem:[#allocation3 + $0x38] sm:$0xff]  ;;  %v1889_v13 = vld [vmem:[#allocation3 + $0x40] sm:$0xff] }
 0x127   : > { %2255 = vst.msk [vmem:[#allocation3 + $0x8] sm:$0xff] %vm1759_vm2, %v2239_v9  ;;  %v4172_v46 = vmul.f32 %v4143_v21, %v3982_v29  ;;  %2089 = vst.msk [vmem:[#allocation3 + $0x28] sm:$0xff] %vm1759_vm2, %v2073_v26  ;;  %v2125_v61 = vmul.f32 %v4005_v59, %v4047_v41  ;;  %v4180_v63 = vmul.f32 %v4154_v10, %v4011_v3  ;;  %v744_v29 = vmax.f32 %v691_v60, 0.0  ;;  %v4188_v19 = vld [vmem:[#allocation2 + $0x68] sm:$0xff] }
 0x128   : > { %1776 = vst.msk [vmem:[#allocation2 + $0x78] sm:$0xff] %vm1759_vm2, %v1540_v20  ;;  %v1957_v42 = vmul.f32 %v3910_v47, %v4156_v57  ;;  %v1557_v40 = vcombine.low %v1549_v51, %v1556_v35  ;;  %v2042_v12 = vmul.f32 %v3955_v58, %v4116_v18  ;;  %v1174_v3 = vcombine.high %v1172_v32, %v1172_v32  ;;  %v4193_v9 = vld [vmem:[#allocation2 + $0x61] sm:$0xff] }
 0x129   : > { %v2224_v25 = vld [vmem:[#allocation3 + $0x10] sm:$0xff]  ;;  %v2141_v48 = vld [vmem:[#allocation3 + $0x20] sm:$0xff]  ;;  %1778 = vst.msk [vmem:[#allocation2 + $0x88] sm:$0x3] %vm1762_vm3, %v1564_v30  ;;  %v1821_v45 = vmul.f32 %v3836_v1, %v4188_v19  ;;  %v4199_v62 = vmul.f32 %v4154_v10, %v4038_v56  ;;  %v2294_v37 = vmul.f32 %v4073_v39, %v3990_v34  ;;  %v1873_v60 = vmul.f32 %v3860_v43, %v4193_v9 }
 0x12a   : > { %v2308_v55 = vld [vmem:[#allocation3] sm:$0xff]  ;;  %v2240_v24 = vadd.f32 %v2224_v25, %v4104_v16  ;;  %v2157_v14 = vadd.f32 %v2141_v48, %v2125_v61  ;;  %v1989_v53 = vadd.f32 %v1973_v7, %v1957_v42  ;;  %1777 = vst.msk [vmem:[#allocation2 + $0x80] sm:$0xff] %vm1759_vm2, %v1557_v40  ;;  %v1175_v16 = vcombine.high %v905_v28, %v905_v28 }
 0x12b   : > { %v2324_v23 = vadd.f32 %v2308_v55, %v4088_v38  ;;  %v2058_v38 = vld [vmem:[#allocation3 + $0x30] sm:$0xff]  ;;  %v1182_v26 = vrot.slane %v905_v28, %v3789_v15  ;;  %v2126_v56 = vmul.f32 %v4005_v59, %v4093_v36  ;;  %1837 = vst.msk [vmem:[#allocation3 + $0x48] sm:$0xff] %vm1759_vm2, %v1821_v45  ;;  %v906_v34 = vmul.f32 %v3775_v0, %v744_v29 }
 0x12c   : > { %2256 = vst.msk [vmem:[#allocation3 + $0x10] sm:$0xff] %vm1759_vm2, %v2240_v24  ;;  %2173 = vst.msk [vmem:[#allocation3 + $0x20] sm:$0xff] %vm1759_vm2, %v2157_v14  ;;  %v2074_v51 = vadd.f32 %v2058_v38, %v2042_v12  ;;  %v4215_v35 = vadd.f32 %v3782_v5, %v4036_v54  ;;  %v2210_v28 = vmul.f32 %v4058_v6, %v4109_v49  ;;  %v4254_v12 = vld [vmem:[#allocation2 + $0x62] sm:$0xff] }
 0x12d   : > { %2340 = vst.msk [vmem:[#allocation3] sm:$0xff] %vm1759_vm2, %v2324_v23  ;;  %v2225_v20 = vld [vmem:[#allocation3 + $0x18] sm:$0xff]  ;;  %2005 = vst.msk [vmem:[#allocation3 + $0x38] sm:$0xff] %vm1759_vm2, %v1989_v53  ;;  %v1905_v25 = vadd.f32 %v1889_v13, %v1873_v60  ;;  %v4219_v42 = vcombine.low %v1172_v32, %v1174_v3  ;;  %v4223_v55 = vmul.f32 %v4058_v6, %v4156_v57 }
 0x12e   : > { %v2241_v30 = vadd.f32 %v2225_v20, %v2209_v31  ;;  %v2309_v61 = vld [vmem:[#allocation3 + $0x8] sm:$0xff]  ;;  %v2295_v0 = vmul.f32 %v4073_v39, %v4045_v52  ;;  %2090 = vst.msk [vmem:[#allocation3 + $0x30] sm:$0xff] %vm1759_vm2, %v2074_v51  ;;  %v4231_v54 = vrot.slane %v1175_v16, %v3789_v15  ;;  %v4236_v32 = vmul.f32 %v4143_v21, %v4047_v41  ;;  %v4280_v20 = vld [vmem:[#allocation2 + $0x6a] sm:$0xff] }
 0x12f   : > { %v2325_v48 = vadd.f32 %v2309_v61, %v2293_v33  ;;  %v2142_v40 = vld [vmem:[#allocation3 + $0x28] sm:$0xff]  ;;  %1921 = vst.msk [vmem:[#allocation3 + $0x40] sm:$0xff] %vm1759_vm2, %v1905_v25  ;;  %v4239_v33 = vld [vmem:[#allocation2 + $0x69] sm:$0xff]  ;;  %v1190_v29 = vcombine.high %v1182_v26, %v1182_v26  ;;  %v4246_v24 = vmul.f32 %v4143_v21, %v4093_v36  ;;  %v4250_v7 = vmul.f32 %v4073_v39, %v4116_v18  ;;  %v4266_v18 = vld [vmem:[%s4868_s3] ss:$0 sm:$0xff] }
 0x130   : > { %v4228_v5 = vld [vmem:[#allocation2 + $0x78] sm:$0xff]  ;;  %2257 = vst.msk [vmem:[#allocation3 + $0x18] sm:$0xff] %vm1759_vm2, %v2241_v30  ;;  %v2158_v31 = vadd.f32 %v2142_v40, %v2126_v56  ;;  %v1192_v41 = vcombine.high %v906_v34, %v906_v34  ;;  %v745_v14 = vmax.f32 %v4215_v35, 0.0  ;;  %v2043_v3 = vmul.f32 %v3955_v58, %v4188_v19 }
 0x131   : > { %v1822_v52 = vmul.f32 %v3836_v1, %v4228_v5  ;;  %2341 = vst.msk [vmem:[#allocation3 + $0x8] sm:$0xff] %vm1759_vm2, %v2325_v48  ;;  %v1573_v36 = vrot.slane %v4219_v42, %v3789_v15  ;;  %v4261_v23 = vld [vmem:[#allocation2 + $0x80] sm:$0xff]  ;;  %v4270_v53 = vadd.f32 %v4266_v18, %v4065_v2  ;;  %v4274_v45 = vadd.f32 %v4266_v18, %v4097_v50 }
 0x132   : > { %2174 = vst.msk [vmem:[#allocation3 + $0x28] sm:$0xff] %vm1759_vm2, %v2158_v31  ;;  %v2127_v38 = vmul.f32 %v4005_v59, %v4193_v9  ;;  %v1874_v60 = vmul.f32 %v3860_v43, %v4239_v33  ;;  %v1823_v56 = vmul.f32 %v3836_v1, %v4261_v23  ;;  %v1191_v2 = vcombine.high %v4231_v54, %v4231_v54  ;;  %v1890_v61 = vld [vmem:[#allocation3 + $0x48] sm:$0xff] }
 0x133   : > { %1838 = vst.msk [vmem:[#allocation3 + $0x50] sm:$0xff] %vm1759_vm2, %v1822_v52  ;;  %v2310_v13 = vld [vmem:[#allocation3 + $0x10] sm:$0xff]  ;;  %v2226_v16 = vld [vmem:[#allocation3 + $0x20] sm:$0xff]  ;;  %v1566_v25 = vcombine.low %v1182_v26, %v1190_v29  ;;  %v1199_v42 = vrot.slane %v906_v34, %v3789_v15  ;;  %v1206_v1 = vrot.slane %v1192_v41, %v3789_v15  ;;  %v4298_v34 = vmul.f32 %v4058_v6, %v4254_v12 }
 0x134   : > { %v2393_v51 = vld [vmem:[#allocation3] sm:$0xff]  ;;  %v2326_v35 = vadd.f32 %v2310_v13, %v2294_v37  ;;  %v2242_v50 = vadd.f32 %v2226_v16, %v2210_v28  ;;  %v2059_v30 = vld [vmem:[#allocation3 + $0x38] sm:$0xff]  ;;  %v1906_v31 = vadd.f32 %v1890_v61, %v1874_v60  ;;  %1839 = vst.msk [vmem:[#allocation3 + $0x58] sm:$0xff] %vm1759_vm2, %v1823_v56  ;;  %v4289_v52 = vld [vmem:[#allocation2 + $0x79] sm:$0xff]  ;;  %v1958_v37 = vmul.f32 %v3910_v47, %v4254_v12 }
 0x135   : > { %v2409_v48 = vadd.f32 %v2393_v51, %v4168_v44  ;;  %v2075_v40 = vadd.f32 %v2059_v30, %v2043_v3  ;;  %v2143_v26 = vld [vmem:[#allocation3 + $0x30] sm:$0xff]  ;;  %v4302_v44 = vmul.f32 %v4073_v39, %v4188_v19  ;;  %v1959_v28 = vmul.f32 %v3910_v47, %v4280_v20 }
 0x136   : > { %2342 = vst.msk [vmem:[#allocation3 + $0x10] sm:$0xff] %vm1759_vm2, %v2326_v35  ;;  %2258 = vst.msk [vmem:[#allocation3 + $0x20] sm:$0xff] %vm1759_vm2, %v2242_v50  ;;  %v1974_v41 = vld [vmem:[#allocation3 + $0x40] sm:$0xff]  ;;  %v2159_v3 = vadd.f32 %v2143_v26, %v2127_v38  ;;  %v907_v13 = vmul.f32 %v3777_v4, %v745_v14  ;;  %v746_v16 = vmax.f32 %v4270_v53, 0.0  ;;  %v747_v60 = vmax.f32 %v4274_v45, 0.0  ;;  %v4312_v35 = vld [vmem:[#allocation2 + $0x81] sm:$0xff] }
 0x137   : > { %2425 = vst.msk [vmem:[#allocation3] sm:$0xff] %vm1759_vm2, %v2409_v48  ;;  %v2311_v29 = vld [vmem:[#allocation3 + $0x18] sm:$0xff]  ;;  %2091 = vst.msk [vmem:[#allocation3 + $0x38] sm:$0xff] %vm1759_vm2, %v2075_v40  ;;  %v1990_v51 = vadd.f32 %v1974_v41, %v1958_v37  ;;  %v1875_v50 = vmul.f32 %v3860_v43, %v4289_v52  ;;  %v1580_v38 = vrot.slane %v1566_v25, %v3789_v15  ;;  %v4337_v41 = vld [vmem:[#allocation2 + $0x7a] sm:$0xff] }
 0x138   : > { %1922 = vst.msk [vmem:[#allocation3 + $0x48] sm:$0xff] %vm1759_vm2, %v1906_v31  ;;  %v2394_v19 = vld [vmem:[#allocation3 + $0x8] sm:$0xff]  ;;  %v2327_v56 = vadd.f32 %v2311_v29, %v2295_v0  ;;  %2175 = vst.msk [vmem:[#allocation3 + $0x30] sm:$0xff] %vm1759_vm2, %v2159_v3  ;;  %v1582_v14 = vcombine.low %v4231_v54, %v1191_v2  ;;  %v1207_v53 = vcombine.high %v1199_v42, %v1199_v42 }
 0x139   : > { %v2410_v30 = vadd.f32 %v2394_v19, %v4172_v46  ;;  %v2227_v61 = vld [vmem:[#allocation3 + $0x28] sm:$0xff]  ;;  %v1605_v45 = vrot.slane %v1206_v1, %v3789_v15  ;;  %2006 = vst.msk [vmem:[#allocation3 + $0x40] sm:$0xff] %vm1759_vm2, %v1990_v51  ;;  %v1581_v40 = vcombine.low %v1573_v36, %v1580_v38  ;;  %v1208_v25 = vcombine.high %v1206_v1, %v1206_v1 }
 0x13a   : > { %v1891_v4 = vld [vmem:[#allocation3 + $0x50] sm:$0xff]  ;;  %v2243_v0 = vadd.f32 %v2227_v61, %v4223_v55  ;;  %2343 = vst.msk [vmem:[#allocation3 + $0x18] sm:$0xff] %vm1759_vm2, %v2327_v56  ;;  %v1876_v46 = vmul.f32 %v3860_v43, %v4312_v35  ;;  %v1583_v31 = vcombine.low %v1199_v42, %v1207_v53  ;;  %v1209_v54 = vcombine.high %v907_v13, %v907_v13 }
 0x13b   : > { %v1907_v48 = vadd.f32 %v1891_v4, %v1875_v50  ;;  %2426 = vst.msk [vmem:[#allocation3 + $0x8] sm:$0xff] %vm1759_vm2, %v2410_v30  ;;  %v1216_v2 = vrot.slane %v907_v13, %v3789_v15  ;;  %v2128_v55 = vmul.f32 %v4005_v59, %v4239_v33  ;;  %v1892_v37 = vld [vmem:[#allocation3 + $0x58] sm:$0xff]  ;;  %v1590_v36 = vrot.slane %v1582_v14, %v3789_v15 }
 0x13c   : > { %1781 = vst.msk [vmem:[#allocation2 + $0xa0] sm:$0x3] %vm1762_vm3, %v1605_v45  ;;  %v908_v43 = vmul.f32 %v3784_v8, %v746_v16  ;;  %v909_v42 = vmul.f32 %v3787_v11, %v747_v60  ;;  %v1908_v29 = vadd.f32 %v1892_v37, %v1876_v46  ;;  %v1597_v3 = vrot.slane %v1583_v31, %v3789_v15 }
 0x13d   : > { %2259 = vst.msk [vmem:[#allocation3 + $0x28] sm:$0xff] %vm1759_vm2, %v2243_v0  ;;  %1923 = vst.msk [vmem:[#allocation3 + $0x50] sm:$0xff] %vm1759_vm2, %v1907_v48  ;;  %v2395_v1 = vld [vmem:[#allocation3 + $0x10] sm:$0xff]  ;;  %v2312_v26 = vld [vmem:[#allocation3 + $0x20] sm:$0xff]  ;;  %v4341_v13 = vrot.slane %v1209_v54, %v3789_v15  ;;  %v1224_v19 = vcombine.high %v1216_v2, %v1216_v2  ;;  %v1606_v8 = vcombine.low %v1208_v25, %v1216_v2 }
 0x13e   : > { %1779 = vst.msk [vmem:[#allocation2 + $0x90] sm:$0xff] %vm1759_vm2, %v1581_v40  ;;  %v2411_v56 = vadd.f32 %v2395_v1, %v4236_v32  ;;  %v2328_v51 = vadd.f32 %v2312_v26, %v4250_v7  ;;  %v2144_v38 = vld [vmem:[#allocation3 + $0x38] sm:$0xff]  ;;  %v1226_v16 = vcombine.high %v908_v43, %v908_v43  ;;  %1924 = vst.msk [vmem:[#allocation3 + $0x58] sm:$0xff] %vm1759_vm2, %v1908_v29  ;;  %v2478_v37 = vld [vmem:[#allocation3] sm:$0xff] }
 0x13f   : > { %v1975_v50 = vld [vmem:[#allocation3 + $0x48] sm:$0xff]  ;;  %v2160_v60 = vadd.f32 %v2144_v38, %v2128_v55  ;;  %v1598_v30 = vcombine.low %v1590_v36, %v1597_v3  ;;  %v1607_v61 = vcombine.low %v1224_v19, %v4341_v13  ;;  %v2228_v4 = vld [vmem:[#allocation3 + $0x30] sm:$0xff]  ;;  %v2044_v32 = vmul.f32 %v3955_v58, %v4228_v5 }
 0x140   : > { %v1991_v11 = vadd.f32 %v1975_v50, %v1959_v28  ;;  %2427 = vst.msk [vmem:[#allocation3 + $0x10] sm:$0xff] %vm1759_vm2, %v2411_v56  ;;  %2344 = vst.msk [vmem:[#allocation3 + $0x20] sm:$0xff] %vm1759_vm2, %v2328_v51  ;;  %v1960_v7 = vmul.f32 %v3910_v47, %v4337_v41  ;;  %v4354_v14 = vrot.slane %v908_v43, %v3789_v15  ;;  %v2060_v0 = vld [vmem:[#allocation3 + $0x40] sm:$0xff]  ;;  %v4364_v2 = vld [vmem:[#allocation2 + $0x82] sm:$0xff] }
 0x141   : > { %v1240_v28 = vrot.slane %v1226_v16, %v3789_v15  ;;  %v2396_v53 = vld [vmem:[#allocation3 + $0x18] sm:$0xff]  ;;  %v2244_v45 = vadd.f32 %v2228_v4, %v4298_v34  ;;  %2176 = vst.msk [vmem:[#allocation3 + $0x38] sm:$0xff] %vm1759_vm2, %v2160_v60  ;;  %1780 = vst.msk [vmem:[#allocation2 + $0x98] sm:$0xff] %vm1759_vm2, %v1598_v30  ;;  %v1614_v48 = vrot.slane %v1606_v8, %v3789_v15 }
 0x142   : > { %2007 = vst.msk [vmem:[#allocation3 + $0x48] sm:$0xff] %vm1759_vm2, %v1991_v11  ;;  %v1621_v40 = vrot.slane %v1607_v61, %v3789_v15  ;;  %v1243_v25 = vcombine.high %v909_v42, %v909_v42  ;;  %v2479_v46 = vld [vmem:[#allocation3 + $0x8] sm:$0xff]  ;;  %v2412_v31 = vadd.f32 %v2396_v53, %v4246_v24  ;;  %v2076_v54 = vadd.f32 %v2060_v0, %v2044_v32 }
 0x143   : > { %v1242_v55 = vcombine.high %v1240_v28, %v1240_v28  ;;  %v1250_v34 = vrot.slane %v909_v42, %v3789_v15  ;;  %v2495_v36 = vadd.f32 %v2479_v46, %v4199_v62  ;;  %2260 = vst.msk [vmem:[#allocation3 + $0x30] sm:$0xff] %vm1759_vm2, %v2244_v45  ;;  %v1241_v3 = vcombine.high %v4354_v14, %v4354_v14  ;;  %v4380_v62 = vld [vmem:[%s4869_s4] ss:$0 sm:$0xff] }
 0x144   : > { %v2313_v43 = vld [vmem:[#allocation3 + $0x28] sm:$0xff]  ;;  %v1976_v1 = vld [vmem:[#allocation3 + $0x50] sm:$0xff]  ;;  %v1622_v29 = vcombine.low %v1614_v48, %v1621_v40  ;;  %v1257_v24 = vrot.slane %v1243_v25, %v3789_v15  ;;  %2428 = vst.msk [vmem:[#allocation3 + $0x18] sm:$0xff] %vm1759_vm2, %v2412_v31  ;;  %2092 = vst.msk [vmem:[#allocation3 + $0x40] sm:$0xff] %vm1759_vm2, %v2076_v54  ;;  %v711_v51 = vadd.f32 %v4266_v18, %v4124_v27 }
 0x145   : > { %v4369_v26 = vld [vmem:[#allocation2 + $0x90] sm:$0xff]  ;;  %v2329_v19 = vadd.f32 %v2313_v43, %v4302_v44  ;;  %v1992_v42 = vadd.f32 %v1976_v1, %v1960_v7  ;;  %2511 = vst.msk [vmem:[#allocation3 + $0x8] sm:$0xff] %vm1759_vm2, %v2495_v36  ;;  %v1961_v50 = vmul.f32 %v3910_v47, %v4364_v2  ;;  %v1225_v44 = vcombine.high %v4341_v13, %v4341_v13  ;;  %v1977_v18 = vld [vmem:[#allocation3 + $0x58] sm:$0xff] }
 0x146   : > { %v1824_v56 = vmul.f32 %v4380_v62, %v4369_v26  ;;  %1782 = vst.msk [vmem:[#allocation2 + $0xa8] sm:$0xff] %vm1759_vm2, %v1622_v29  ;;  %v1646_v38 = vrot.slane %v1242_v55, %v3789_v15  ;;  %v2381_v8 = vmul.f32 %v4143_v21, %v4193_v9  ;;  %v2213_v27 = vmul.f32 %v4058_v6, %v4280_v20  ;;  %v4446_v29 = vld [vmem:[%s4869_s4 + $0x1] ss:$0 sm:$0xff] }
 0x147   : > { %2345 = vst.msk [vmem:[#allocation3 + $0x28] sm:$0xff] %vm1759_vm2, %v2329_v19  ;;  %2008 = vst.msk [vmem:[#allocation3 + $0x50] sm:$0xff] %vm1759_vm2, %v1992_v42  ;;  %v2045_v47 = vmul.f32 %v3955_v58, %v4261_v23  ;;  %v2494_v13 = vadd.f32 %v2478_v37, %v4180_v63  ;;  %v2397_v16 = vld [vmem:[#allocation3 + $0x20] sm:$0xff]  ;;  %v1993_v11 = vadd.f32 %v1977_v18, %v1961_v50  ;;  %v748_v63 = vmax.f32 %v711_v51, 0.0 }
 0x148   : > { %1840 = vst.msk [vmem:[#allocation3 + $0x60] sm:$0xff] %vm1759_vm2, %v1824_v56  ;;  %v1624_v60 = vcombine.low %v1241_v3, %v1240_v28  ;;  %v1258_v9 = vcombine.high %v1250_v34, %v1250_v34  ;;  %v1259_v30 = vcombine.high %v1257_v24, %v1257_v24  ;;  %v4406_v61 = vmul.f32 %v4154_v10, %v4109_v49  ;;  %v2229_v32 = vld [vmem:[#allocation3 + $0x38] sm:$0xff]  ;;  %v4410_v45 = vld [vmem:[#allocation2 + $0x98] sm:$0xff] }
 0x149   : > { %1784 = vst.msk [vmem:[#allocation2 + $0xb8] sm:$0x3] %vm1762_vm3, %v1646_v38  ;;  %v2413_v4 = vadd.f32 %v2397_v16, %v2381_v8  ;;  %v2298_v7 = vmul.f32 %v4073_v39, %v4228_v5  ;;  %v2061_v53 = vld [vmem:[#allocation3 + $0x48] sm:$0xff]  ;;  %v2245_v28 = vadd.f32 %v2229_v32, %v2213_v27  ;;  %v1825_v48 = vmul.f32 %v4380_v62, %v4410_v45 }
 0x14a   : > { %2510 = vst.msk [vmem:[#allocation3] sm:$0xff] %vm1759_vm2, %v2494_v13  ;;  %2009 = vst.msk [vmem:[#allocation3 + $0x58] sm:$0xff] %vm1759_vm2, %v1993_v11  ;;  %v2077_v0 = vadd.f32 %v2061_v53, %v2045_v47  ;;  %v4416_v49 = vld [vmem:[#allocation2 + $0x91] sm:$0xff]  ;;  %v1623_v40 = vcombine.low %v1225_v44, %v4354_v14  ;;  %v2465_v5 = vmul.f32 %v4154_v10, %v4156_v57  ;;  %v2314_v31 = vld [vmem:[#allocation3 + $0x30] sm:$0xff] }
 0x14b   : > { %v4423_v25 = vmul.f32 %v4154_v10, %v4254_v12  ;;  %2429 = vst.msk [vmem:[#allocation3 + $0x20] sm:$0xff] %vm1759_vm2, %v2413_v4  ;;  %v2382_v46 = vmul.f32 %v4143_v21, %v4239_v33  ;;  %v2129_v54 = vmul.f32 %v4005_v59, %v4289_v52  ;;  %2261 = vst.msk [vmem:[#allocation3 + $0x38] sm:$0xff] %vm1759_vm2, %v2245_v28  ;;  %v2145_v14 = vld [vmem:[#allocation3 + $0x40] sm:$0xff]  ;;  %v4437_v33 = vld [vmem:[%s4870_s5] ss:$0 sm:$0xff] }
 0x14c   : > { %v2330_v55 = vadd.f32 %v2314_v31, %v2298_v7  ;;  %2093 = vst.msk [vmem:[#allocation3 + $0x48] sm:$0xff] %vm1759_vm2, %v2077_v0  ;;  %1841 = vst.msk [vmem:[#allocation3 + $0x68] sm:$0xff] %vm1759_vm2, %v1825_v48  ;;  %v1638_v57 = vrot.slane %v1624_v60, %v3789_v15  ;;  %v1647_v12 = vcombine.low %v1250_v34, %v1258_v9  ;;  %v4441_v1 = vld [vmem:[#allocation2 + $0x99] sm:$0xff]  ;;  %v2481_v16 = vld [vmem:[#allocation3 + $0x18] sm:$0xff] }
 0x14d   : > { %v1648_v37 = vcombine.low %v1257_v24, %v1259_v30  ;;  %v2161_v36 = vadd.f32 %v2145_v14, %v2129_v54  ;;  %v2046_v43 = vmul.f32 %v3955_v58, %v4369_v26  ;;  %v1877_v34 = vmul.f32 %v4446_v29, %v4416_v49  ;;  %v4450_v3 = vld [vmem:[#allocation2 + $0xa8] sm:$0xff]  ;;  %v2527_v19 = vld [vmem:[#allocation3 + $0x8] sm:$0xff]  ;;  %v2480_v13 = vld [vmem:[#allocation3 + $0x10] sm:$0xff] }
 0x14e   : > { %v910_v24 = vmul.f32 %v3793_v22, %v748_v63  ;;  %v2398_v42 = vld [vmem:[#allocation3 + $0x28] sm:$0xff]  ;;  %2346 = vst.msk [vmem:[#allocation3 + $0x30] sm:$0xff] %vm1759_vm2, %v2330_v55  ;;  %v2130_v56 = vmul.f32 %v4005_v59, %v4312_v35  ;;  %v2299_v51 = vmul.f32 %v4073_v39, %v4261_v23  ;;  %v2062_v50 = vld [vmem:[#allocation3 + $0x50] sm:$0xff]  ;;  %v1826_v38 = vmul.f32 %v4380_v62, %v4450_v3 }
 0x14f   : > { %v1893_v44 = vld [vmem:[#allocation3 + $0x60] sm:$0xff]  ;;  %v1631_v8 = vrot.slane %v1623_v40, %v3789_v15  ;;  %v2414_v27 = vadd.f32 %v2398_v42, %v2382_v46  ;;  %2177 = vst.msk [vmem:[#allocation3 + $0x40] sm:$0xff] %vm1759_vm2, %v2161_v36  ;;  %v2078_v22 = vadd.f32 %v2062_v50, %v2046_v43  ;;  %v2047_v47 = vmul.f32 %v3955_v58, %v4410_v45  ;;  %v4497_v50 = vld [vmem:[#allocation2 + $0x9a] sm:$0xff] }
 0x150   : > { %v1909_v18 = vadd.f32 %v1893_v44, %v1877_v34  ;;  %v1878_v23 = vmul.f32 %v4446_v29, %v4441_v1  ;;  %1842 = vst.msk [vmem:[#allocation3 + $0x70] sm:$0xff] %vm1759_vm2, %v1826_v38  ;;  %v1655_v60 = vrot.slane %v1647_v12, %v3789_v15  ;;  %v1662_v9 = vrot.slane %v1648_v37, %v3789_v15  ;;  %v4480_v34 = vld [vmem:[#allocation2 + $0x92] sm:$0xff]  ;;  %v4502_v44 = vld [vmem:[%s4869_s4 + $0x2] ss:$0 sm:$0xff] }
 0x151   : > { %v1639_v11 = vcombine.low %v1631_v8, %v1638_v57  ;;  %v2526_v30 = vld [vmem:[#allocation3] sm:$0xff]  ;;  %2430 = vst.msk [vmem:[#allocation3 + $0x28] sm:$0xff] %vm1759_vm2, %v2414_v27  ;;  %2094 = vst.msk [vmem:[#allocation3 + $0x50] sm:$0xff] %vm1759_vm2, %v2078_v22  ;;  %v2063_v58 = vld [vmem:[#allocation3 + $0x58] sm:$0xff]  ;;  %v1260_v4 = vcombine.high %v910_v24, %v910_v24  ;;  %v1267_v32 = vrot.slane %v910_v24, %v3789_v15 }
 0x152   : > { %1925 = vst.msk [vmem:[#allocation3 + $0x60] sm:$0xff] %vm1759_vm2, %v1909_v18  ;;  %v2549_v7 = vadd.f32 %v4437_v33, %v2526_v30  ;;  %v2550_v53 = vadd.f32 %v4437_v33, %v2527_v19  ;;  %v2079_v63 = vadd.f32 %v2063_v58, %v2047_v47  ;;  %v1663_v28 = vcombine.low %v1655_v60, %v1662_v9  ;;  %v2482_v40 = vld [vmem:[#allocation3 + $0x20] sm:$0xff]  ;;  %v2315_v31 = vld [vmem:[#allocation3 + $0x38] sm:$0xff] }
 0x153   : > { %1783 = vst.msk [vmem:[#allocation2 + $0xb0] sm:$0xff] %vm1759_vm2, %v1639_v11  ;;  %v2496_v0 = vadd.f32 %v2480_v13, %v4406_v61  ;;  %v2497_v48 = vadd.f32 %v2481_v16, %v2465_v5  ;;  %v2146_v46 = vld [vmem:[#allocation3 + $0x48] sm:$0xff]  ;;  %v2383_v54 = vmul.f32 %v4143_v21, %v4289_v52  ;;  %v1274_v14 = vrot.slane %v1260_v4, %v3789_v15 }
 0x154   : > { %v1894_v55 = vld [vmem:[#allocation3 + $0x68] sm:$0xff]  ;;  %v2565_v57 = vmax.f32 %v2549_v7, 0.0  ;;  %v2566_v12 = vmax.f32 %v2550_v53, 0.0  ;;  %v2162_v37 = vadd.f32 %v2146_v46, %v2130_v56  ;;  %v2331_v36 = vadd.f32 %v2315_v31, %v2299_v51  ;;  %2095 = vst.msk [vmem:[#allocation3 + $0x58] sm:$0xff] %vm1759_vm2, %v2079_v63  ;;  %1785 = vst.msk [vmem:[#allocation2 + $0xc0] sm:$0xff] %vm1759_vm2, %v1663_v28 }
 0x155   : > { %v1910_v43 = vadd.f32 %v1894_v55, %v1878_v23  ;;  %2512 = vst.msk [vmem:[#allocation3 + $0x10] sm:$0xff] %vm1759_vm2, %v2496_v0  ;;  %2513 = vst.msk [vmem:[#allocation3 + $0x18] sm:$0xff] %vm1759_vm2, %v2497_v48  ;;  %v2498_v52 = vadd.f32 %v2482_v40, %v4423_v25  ;;  %v2214_v61 = vmul.f32 %v4058_v6, %v4337_v41  ;;  %v2399_v5 = vld [vmem:[#allocation3 + $0x30] sm:$0xff] }
 0x156   : > { %v1275_v24 = vcombine.high %v1267_v32, %v1267_v32  ;;  %v1276_v19 = vcombine.high %v1274_v14, %v1274_v14  ;;  %3370 = vmatprep.mubr.msk.f32.mxu1 %vm1759_vm2, %v2565_v57  ;;  %v2467_v42 = vmul.f32 %v4154_v10, %v4280_v20  ;;  %2178 = vst.msk [vmem:[#allocation3 + $0x48] sm:$0xff] %vm1759_vm2, %v2162_v37  ;;  %v2230_v56 = vld [vmem:[#allocation3 + $0x40] sm:$0xff]  ;;  %2347 = vst.msk [vmem:[#allocation3 + $0x38] sm:$0xff] %vm1759_vm2, %v2331_v36 }
 0x157   : > { %v2415_v51 = vadd.f32 %v2399_v5, %v2383_v54  ;;  %1926 = vst.msk [vmem:[#allocation3 + $0x68] sm:$0xff] %vm1759_vm2, %v1910_v43  ;;  %3371 = vmatmul.mubr.msk.f32.vlgmr.msra.gmra.mxu1 %vm1759_vm2, %v2566_v12  ;;  %2514 = vst.msk [vmem:[#allocation3 + $0x20] sm:$0xff] %vm1759_vm2, %v2498_v52  ;;  %v2246_v25 = vadd.f32 %v2230_v56, %v2214_v61  ;;  %v1962_v20 = vmul.f32 %v4502_v44, %v4480_v34  ;;  %v1895_v60 = vld [vmem:[#allocation3 + $0x70] sm:$0xff] }
 0x158   : > { %v2131_v38 = vmul.f32 %v4005_v59, %v4416_v49  ;;  %v1665_v8 = vcombine.low %v1274_v14, %v1276_v19  ;;  %3395 = vmatpush3.msra.mxu1 %v4018_v17  ;;  %v2483_v27 = vld [vmem:[#allocation3 + $0x28] sm:$0xff]  ;;  %v2147_v18 = vld [vmem:[#allocation3 + $0x50] sm:$0xff]  ;;  %v1664_v9 = vcombine.low %v1267_v32, %v1275_v24  ;;  %v2132_v30 = vmul.f32 %v4005_v59, %v4441_v1 }
 0x159   : > { %2431 = vst.msk [vmem:[#allocation3 + $0x30] sm:$0xff] %vm1759_vm2, %v2415_v51  ;;  %v1978_v22 = vld [vmem:[#allocation3 + $0x60] sm:$0xff]  ;;  %v2499_v47 = vadd.f32 %v2483_v27, %v2467_v42  ;;  %2262 = vst.msk [vmem:[#allocation3 + $0x40] sm:$0xff] %vm1759_vm2, %v2246_v25  ;;  %v2215_v4 = vmul.f32 %v4058_v6, %v4364_v2  ;;  %v2384_v59 = vmul.f32 %v4143_v21, %v4312_v35  ;;  %v4552_v19 = vld [vmem:[%s4869_s4 + $0x3] ss:$0 sm:$0xff] }
 0x15a   : > { %v1994_v13 = vadd.f32 %v1978_v22, %v1962_v20  ;;  %v2163_v16 = vadd.f32 %v2147_v18, %v2131_v38  ;;  %v4511_v23 = vld [vmem:[#allocation2 + $0xb0] sm:$0xff]  ;;  %v1679_v32 = vrot.slane %v1665_v8, %v3789_v15  ;;  %v1672_v31 = vrot.slane %v1664_v9, %v3789_v15 }
 0x15b   : > { %v4513_v11 = vld [vmem:[#allocation2 + $0xa9] sm:$0xff]  ;;  %v1827_v17 = vmul.f32 %v4380_v62, %v4511_v23  ;;  %2515 = vst.msk [vmem:[#allocation3 + $0x28] sm:$0xff] %vm1759_vm2, %v2499_v47  ;;  %v1963_v62 = vmul.f32 %v4502_v44, %v4497_v50  ;;  %v2468_v14 = vmul.f32 %v4154_v10, %v4337_v41  ;;  %v2300_v12 = vmul.f32 %v4073_v39, %v4369_v26  ;;  %v4539_v37 = vld [vmem:[#allocation2 + $0xb1] sm:$0xff] }
 0x15c   : > { %v1879_v58 = vmul.f32 %v4446_v29, %v4513_v11  ;;  %2010 = vst.msk [vmem:[#allocation3 + $0x60] sm:$0xff] %vm1759_vm2, %v1994_v13  ;;  %v2148_v7 = vld [vmem:[#allocation3 + $0x58] sm:$0xff]  ;;  %2179 = vst.msk [vmem:[#allocation3 + $0x50] sm:$0xff] %vm1759_vm2, %v2163_v16  ;;  %v2528_v28 = vld [vmem:[#allocation3 + $0x10] sm:$0xff]  ;;  %v1680_v36 = vcombine.low %v1672_v31, %v1679_v32  ;;  %v2216_v26 = vmul.f32 %v4058_v6, %v4480_v34 }
 0x15d   : > { %v2164_v53 = vadd.f32 %v2148_v7, %v2132_v30  ;;  %1843 = vst.msk [vmem:[#allocation3 + $0x78] sm:$0xff] %vm1759_vm2, %v1827_v17  ;;  %v2529_v0 = vld [vmem:[#allocation3 + $0x18] sm:$0xff]  ;;  %v2231_v48 = vld [vmem:[#allocation3 + $0x48] sm:$0xff]  ;;  %v2551_v43 = vadd.f32 %v4437_v33, %v2528_v28  ;;  %v2048_v42 = vmul.f32 %v4552_v19, %v4450_v3  ;;  %v1880_v38 = vmul.f32 %v4446_v29, %v4539_v37  ;;  %v4593_v31 = vld [vmem:[%s4869_s4 + $0x6] ss:$0 sm:$0xff] }
 0x15e   : > { %v1911_v63 = vadd.f32 %v1895_v60, %v1879_v58  ;;  %v2400_v40 = vld [vmem:[#allocation3 + $0x38] sm:$0xff]  ;;  %v1979_v46 = vld [vmem:[#allocation3 + $0x68] sm:$0xff]  ;;  %v2247_v54 = vadd.f32 %v2231_v48, %v2215_v4  ;;  %v2530_v57 = vld [vmem:[#allocation3 + $0x20] sm:$0xff]  ;;  %v2552_v52 = vadd.f32 %v4437_v33, %v2529_v0  ;;  %1786 = vst.msk [vmem:[#allocation2 + $0xc8] sm:$0xff] %vm1759_vm2, %v1680_v36  ;;  %v2217_v60 = vmul.f32 %v4058_v6, %v4497_v50 }
 0x15f   : > { %v2416_v55 = vadd.f32 %v2400_v40, %v2384_v59  ;;  %v1995_v35 = vadd.f32 %v1979_v46, %v1963_v62  ;;  %2180 = vst.msk [vmem:[#allocation3 + $0x58] sm:$0xff] %vm1759_vm2, %v2164_v53  ;;  %v2553_v61 = vadd.f32 %v4437_v33, %v2530_v57  ;;  %v4556_v56 = vld [vmem:[#allocation2 + $0xaa] sm:$0xff]  ;;  %v2567_v51 = vmax.f32 %v2551_v43, 0.0 }
 0x160   : > { %1927 = vst.msk [vmem:[#allocation3 + $0x70] sm:$0xff] %vm1759_vm2, %v1911_v63  ;;  %v2484_v15 = vld [vmem:[#allocation3 + $0x30] sm:$0xff]  ;;  %2263 = vst.msk [vmem:[#allocation3 + $0x48] sm:$0xff] %vm1759_vm2, %v2247_v54  ;;  %v2316_v41 = vld [vmem:[#allocation3 + $0x40] sm:$0xff]  ;;  %v2568_v8 = vmax.f32 %v2552_v52, 0.0  ;;  %v1964_v29 = vmul.f32 %v4502_v44, %v4556_v56  ;;  %v2469_v30 = vmul.f32 %v4154_v10, %v4364_v2  ;;  %v2301_v6 = vmul.f32 %v4073_v39, %v4410_v45 }
 0x161   : > { %2432 = vst.msk [vmem:[#allocation3 + $0x38] sm:$0xff] %vm1759_vm2, %v2416_v55  ;;  %2011 = vst.msk [vmem:[#allocation3 + $0x68] sm:$0xff] %vm1759_vm2, %v1995_v35  ;;  %v2500_v5 = vadd.f32 %v2484_v15, %v2468_v14  ;;  %v2332_v24 = vadd.f32 %v2316_v41, %v2300_v12  ;;  %v2569_v27 = vmax.f32 %v2553_v61, 0.0  ;;  %3373 = vmatprep.mubr.msk.f32.mxu1 %vm1759_vm2, %v2567_v51  ;;  %v4585_v45 = vld [vmem:[#allocation2 + $0xb2] sm:$0xff]  ;;  %v4604_v14 = vld [vmem:[#allocation2 + $0xc0] sm:$0xff] }
 0x162   : > { %v2531_v22 = vld [vmem:[#allocation3 + $0x28] sm:$0xff]  ;;  %3374 = vmatmul.mubr.msk.f32.gmra.mxu1 %vm1759_vm2, %v2568_v8  ;;  %v2049_v59 = vmul.f32 %v4552_v19, %v4511_v23  ;;  %v2385_v39 = vmul.f32 %v4143_v21, %v4416_v49  ;;  %v2302_v54 = vmul.f32 %v4593_v31, %v4450_v3  ;;  %v4600_v49 = vld [vmem:[%s4869_s4 + $0x4] ss:$0 sm:$0xff]  ;;  %v1965_v12 = vmul.f32 %v4502_v44, %v4585_v45 }
 0x163   : > { %v2232_v25 = vld [vmem:[#allocation3 + $0x50] sm:$0xff]  ;;  %v2064_v20 = vld [vmem:[#allocation3 + $0x60] sm:$0xff]  ;;  %2516 = vst.msk [vmem:[#allocation3 + $0x30] sm:$0xff] %vm1759_vm2, %v2500_v5  ;;  %2348 = vst.msk [vmem:[#allocation3 + $0x40] sm:$0xff] %vm1759_vm2, %v2332_v24  ;;  %v2554_v16 = vadd.f32 %v4437_v33, %v2531_v22  ;;  %3376 = vmatprep.mubr.msk.f32.mxu1 %vm1759_vm2, %v2569_v27  ;;  %v2133_v55 = vmul.f32 %v4600_v49, %v4513_v11  ;;  %v2303_v61 = vmul.f32 %v4593_v31, %v4511_v23 }
 0x164   : > { %v2248_v18 = vadd.f32 %v2232_v25, %v2216_v26  ;;  %v2080_v47 = vadd.f32 %v2064_v20, %v2048_v42  ;;  %v1896_v13 = vld [vmem:[#allocation3 + $0x78] sm:$0xff]  ;;  %v2050_v5 = vmul.f32 %v4552_v19, %v4604_v14  ;;  %v2386_v26 = vmul.f32 %v4143_v21, %v4441_v1 }
 0x165   : > { %v1912_v9 = vadd.f32 %v1896_v13, %v1880_v38  ;;  %v2570_v4 = vmax.f32 %v2554_v16, 0.0  ;;  %v2134_v42 = vmul.f32 %v4600_v49, %v4539_v37  ;;  %v2470_v1 = vmul.f32 %v4154_v10, %v4480_v34  ;;  %v4632_v16 = vld [vmem:[%s4869_s4 + $0x5] ss:$0 sm:$0xff] }
 0x166   : > { %v2233_v17 = vld [vmem:[#allocation3 + $0x58] sm:$0xff]  ;;  %2264 = vst.msk [vmem:[#allocation3 + $0x50] sm:$0xff] %vm1759_vm2, %v2248_v18  ;;  %2096 = vst.msk [vmem:[#allocation3 + $0x60] sm:$0xff] %vm1759_vm2, %v2080_v47 }
 0x167   : > { %v1980_v58 = vld [vmem:[#allocation3 + $0x70] sm:$0xff]  ;;  %v2249_v7 = vadd.f32 %v2233_v17, %v2217_v60  ;;  %1928 = vst.msk [vmem:[#allocation3 + $0x78] sm:$0xff] %vm1759_vm2, %v1912_v9  ;;  %v2317_v2 = vld [vmem:[#allocation3 + $0x48] sm:$0xff]  ;;  %3377 = vmatmul.mubr.msk.f32.gmra.mxu1 %vm1759_vm2, %v2570_v4  ;;  %v2030_v18 = vld [vmem:[#allocation2 + $0xc8] sm:$0xff]  ;;  %v2218_v60 = vmul.f32 %v4632_v16, %v4556_v56  ;;  %v2387_v9 = vmul.f32 %v4143_v21, %v4513_v11 }
 0x168   : > { %v1996_v32 = vadd.f32 %v1980_v58, %v1964_v29  ;;  %v2065_v62 = vld [vmem:[#allocation3 + $0x68] sm:$0xff]  ;;  %v2485_v53 = vld [vmem:[#allocation3 + $0x38] sm:$0xff]  ;;  %v2333_v63 = vadd.f32 %v2317_v2, %v2301_v6  ;;  %v2051_v58 = vmul.f32 %v4552_v19, %v2030_v18 }
 0x169   : > { %2265 = vst.msk [vmem:[#allocation3 + $0x58] sm:$0xff] %vm1759_vm2, %v2249_v7  ;;  %v2081_v28 = vadd.f32 %v2065_v62, %v2049_v59  ;;  %v2501_v0 = vadd.f32 %v2485_v53, %v2469_v30  ;;  %v4638_v29 = vld [vmem:[#allocation2 + $0xc1] sm:$0xff]  ;;  %v2471_v62 = vmul.f32 %v4154_v10, %v4497_v50  ;;  %v2219_v53 = vmul.f32 %v4632_v16, %v4585_v45 }
 0x16a   : > { %2012 = vst.msk [vmem:[#allocation3 + $0x70] sm:$0xff] %vm1759_vm2, %v1996_v32  ;;  %v2532_v48 = vld [vmem:[#allocation3 + $0x30] sm:$0xff]  ;;  %2349 = vst.msk [vmem:[#allocation3 + $0x48] sm:$0xff] %vm1759_vm2, %v2333_v63  ;;  %v2401_v40 = vld [vmem:[#allocation3 + $0x40] sm:$0xff]  ;;  %v2388_v32 = vmul.f32 %v4143_v21, %v4539_v37  ;;  %v2135_v11 = vmul.f32 %v4600_v49, %v4638_v29  ;;  %v2472_v50 = vmul.f32 %v4154_v10, %v4556_v56 }
 0x16b   : > { %2097 = vst.msk [vmem:[#allocation3 + $0x68] sm:$0xff] %vm1759_vm2, %v2081_v28  ;;  %2517 = vst.msk [vmem:[#allocation3 + $0x38] sm:$0xff] %vm1759_vm2, %v2501_v0  ;;  %v2417_v46 = vadd.f32 %v2401_v40, %v2385_v39  ;;  %v2555_v35 = vadd.f32 %v4437_v33, %v2532_v48  ;;  %v2115_v48 = vld [vmem:[#allocation2 + $0xc9] sm:$0xff] }
 0x16d   : > { %v2318_v57 = vld [vmem:[#allocation3 + $0x50] sm:$0xff]  ;;  %v2149_v36 = vld [vmem:[#allocation3 + $0x60] sm:$0xff]  ;;  %2433 = vst.msk [vmem:[#allocation3 + $0x40] sm:$0xff] %vm1759_vm2, %v2417_v46  ;;  %v2571_v41 = vmax.f32 %v2555_v35, 0.0  ;;  %v2304_v46 = vmul.f32 %v4593_v31, %v4604_v14 }
 0x16e   : > { %v2334_v3 = vadd.f32 %v2318_v57, %v2302_v54  ;;  %v1981_v43 = vld [vmem:[#allocation3 + $0x78] sm:$0xff]  ;;  %v2165_v15 = vadd.f32 %v2149_v36, %v2133_v55  ;;  %v2136_v57 = vmul.f32 %v4600_v49, %v2115_v48 }
 0x16f   : > { %v1997_v52 = vadd.f32 %v1981_v43, %v1965_v12  ;;  %3379 = vmatprep.mubr.msk.f32.mxu1 %vm1759_vm2, %v2571_v41  ;;  %v2199_v54 = vld [vmem:[#allocation2 + $0xc2] sm:$0xff] }
 0x170   : > { %2350 = vst.msk [vmem:[#allocation3 + $0x50] sm:$0xff] %vm1759_vm2, %v2334_v3  ;;  %2181 = vst.msk [vmem:[#allocation3 + $0x60] sm:$0xff] %vm1759_vm2, %v2165_v15  ;;  %v2319_v24 = vld [vmem:[#allocation3 + $0x58] sm:$0xff]  ;;  %v2220_v14 = vmul.f32 %v4632_v16, %v2199_v54 }
 0x171   : > { %v2066_v44 = vld [vmem:[#allocation3 + $0x70] sm:$0xff]  ;;  %2013 = vst.msk [vmem:[#allocation3 + $0x78] sm:$0xff] %vm1759_vm2, %v1997_v52  ;;  %v2335_v23 = vadd.f32 %v2319_v24, %v2303_v61  ;;  %v2402_v25 = vld [vmem:[#allocation3 + $0x48] sm:$0xff]  ;;  %v4667_v41 = vld [vmem:[%s4869_s4 + $0x8] ss:$0 sm:$0xff] }
 0x172   : > { %v2082_v51 = vadd.f32 %v2066_v44, %v2050_v5  ;;  %v2150_v20 = vld [vmem:[#allocation3 + $0x68] sm:$0xff]  ;;  %v2533_v38 = vld [vmem:[#allocation3 + $0x38] sm:$0xff]  ;;  %v2418_v8 = vadd.f32 %v2402_v25, %v2386_v26  ;;  %v2473_v10 = vmul.f32 %v4667_v41, %v4585_v45  ;;  %v2305_v5 = vmul.f32 %v4593_v31, %v2030_v18 }
 0x173   : > { %v2166_v27 = vadd.f32 %v2150_v20, %v2134_v42  ;;  %2351 = vst.msk [vmem:[#allocation3 + $0x58] sm:$0xff] %vm1759_vm2, %v2335_v23  ;;  %v2556_v22 = vadd.f32 %v4437_v33, %v2533_v38  ;;  %v2200_v23 = vld [vmem:[#allocation2 + $0xca] sm:$0xff]  ;;  %v2285_v25 = vld [vmem:[#allocation2 + $0xd8] sm:$0xff]  ;;  %v3478_v20 = vld [vmem:[%s4869_s4 + $0x7] ss:$0 sm:$0xff] }
 0x174   : > { %2098 = vst.msk [vmem:[#allocation3 + $0x70] sm:$0xff] %vm1759_vm2, %v2082_v51  ;;  %2434 = vst.msk [vmem:[#allocation3 + $0x48] sm:$0xff] %vm1759_vm2, %v2418_v8  ;;  %v2486_v13 = vld [vmem:[#allocation3 + $0x40] sm:$0xff]  ;;  %v2389_v38 = vmul.f32 %v3478_v20, %v4638_v29  ;;  %v2221_v8 = vmul.f32 %v4632_v16, %v2200_v23 }
 0x175   : > { %2182 = vst.msk [vmem:[#allocation3 + $0x68] sm:$0xff] %vm1759_vm2, %v2166_v27  ;;  %v2572_v47 = vmax.f32 %v2556_v22, 0.0  ;;  %v2502_v34 = vadd.f32 %v2486_v13, %v2470_v1  ;;  %v2306_v13 = vmul.f32 %v4593_v31, %v2285_v25  ;;  %v2789_v25 = vld [vmem:[%s4724_s28 + $0x30] sm:$0xff] }
 0x177   : > { %v2234_v30 = vld [vmem:[#allocation3 + $0x60] sm:$0xff]  ;;  %v2403_v17 = vld [vmem:[#allocation3 + $0x50] sm:$0xff]  ;;  %3380 = vmatmul.mubr.msk.f32.gmra.mxu1 %vm1759_vm2, %v2572_v47  ;;  %2518 = vst.msk [vmem:[#allocation3 + $0x40] sm:$0xff] %vm1759_vm2, %v2502_v34 }
 0x178   : > { %v2250_v4 = vadd.f32 %v2234_v30, %v2218_v60  ;;  %v2419_v7 = vadd.f32 %v2403_v17, %v2387_v9  ;;  %v2067_v6 = vld [vmem:[#allocation3 + $0x78] sm:$0xff]  ;;  %v2390_v17 = vmul.f32 %v3478_v20, %v2115_v48 }
 0x179   : > { %v2083_v59 = vadd.f32 %v2067_v6, %v2051_v58  ;;  %v2286_v6 = vld [vmem:[#allocation2 + $0xe0] sm:$0xff] }
 0x17a   : > { %2266 = vst.msk [vmem:[#allocation3 + $0x60] sm:$0xff] %vm1759_vm2, %v2250_v4  ;;  %v2404_v2 = vld [vmem:[#allocation3 + $0x58] sm:$0xff]  ;;  %2435 = vst.msk [vmem:[#allocation3 + $0x50] sm:$0xff] %vm1759_vm2, %v2419_v7 }
 0x17b   : > { %v2151_v19 = vld [vmem:[#allocation3 + $0x70] sm:$0xff]  ;;  %v2420_v63 = vadd.f32 %v2404_v2, %v2388_v32  ;;  %2099 = vst.msk [vmem:[#allocation3 + $0x78] sm:$0xff] %vm1759_vm2, %v2083_v59  ;;  %v2487_v28 = vld [vmem:[#allocation3 + $0x48] sm:$0xff]  ;;  %v2474_v59 = vmul.f32 %v4667_v41, %v2199_v54 }
 0x17c   : > { %v2167_v21 = vadd.f32 %v2151_v19, %v2135_v11  ;;  %v2235_v37 = vld [vmem:[#allocation3 + $0x68] sm:$0xff]  ;;  %v2503_v39 = vadd.f32 %v2487_v28, %v2471_v62  ;;  %v2307_v11 = vmul.f32 %v4593_v31, %v2286_v6  ;;  %v2371_v48 = vld [vmem:[#allocation2 + $0xe1] sm:$0xff] }
 0x17d   : > { %v2251_v0 = vadd.f32 %v2235_v37, %v2219_v53  ;;  %2436 = vst.msk [vmem:[#allocation3 + $0x58] sm:$0xff] %vm1759_vm2, %v2420_v63  ;;  %v2370_v32 = vld [vmem:[#allocation2 + $0xd9] sm:$0xff]  ;;  %v2475_v37 = vmul.f32 %v4667_v41, %v2200_v23 }
 0x17e   : > { %2183 = vst.msk [vmem:[#allocation3 + $0x70] sm:$0xff] %vm1759_vm2, %v2167_v21  ;;  %v2534_v40 = vld [vmem:[#allocation3 + $0x40] sm:$0xff]  ;;  %2519 = vst.msk [vmem:[#allocation3 + $0x48] sm:$0xff] %vm1759_vm2, %v2503_v39  ;;  %v2391_v53 = vmul.f32 %v3478_v20, %v2370_v32  ;;  %v2455_v31 = vld [vmem:[#allocation2 + $0xda] sm:$0xff] }
 0x17f   : > { %2267 = vst.msk [vmem:[#allocation3 + $0x68] sm:$0xff] %vm1759_vm2, %v2251_v0  ;;  %v2557_v55 = vadd.f32 %v4437_v33, %v2534_v40  ;;  %v2392_v40 = vmul.f32 %v3478_v20, %v2371_v48  ;;  %v2786_v23 = vld [vmem:[%s4724_s28 + $0x18] sm:$0xff] }
 0x180   : > { %v2790_v20 = vld [vmem:[%s4724_s28 + $0x38] sm:$0xff] }
 0x181   : > { %v2320_v35 = vld [vmem:[#allocation3 + $0x60] sm:$0xff]  ;;  %v2488_v12 = vld [vmem:[#allocation3 + $0x50] sm:$0xff]  ;;  %v2573_v43 = vmax.f32 %v2557_v55, 0.0  ;;  %v2476_v55 = vmul.f32 %v4667_v41, %v2455_v31 }
 0x182   : > { %v2336_v36 = vadd.f32 %v2320_v35, %v2304_v46  ;;  %v2152_v3 = vld [vmem:[#allocation3 + $0x78] sm:$0xff]  ;;  %v2504_v15 = vadd.f32 %v2488_v12, %v2472_v50 }
 0x183   : > { %v2168_v56 = vadd.f32 %v2152_v3, %v2136_v57  ;;  %3382 = vmatprep.mubr.msk.f32.mxu1 %vm1759_vm2, %v2573_v43 }
 0x184   : > { %2352 = vst.msk [vmem:[#allocation3 + $0x60] sm:$0xff] %vm1759_vm2, %v2336_v36  ;;  %2520 = vst.msk [vmem:[#allocation3 + $0x50] sm:$0xff] %vm1759_vm2, %v2504_v15  ;;  %v2489_v49 = vld [vmem:[#allocation3 + $0x58] sm:$0xff] }
 0x185   : > { %v2236_v52 = vld [vmem:[#allocation3 + $0x70] sm:$0xff]  ;;  %2184 = vst.msk [vmem:[#allocation3 + $0x78] sm:$0xff] %vm1759_vm2, %v2168_v56  ;;  %v2505_v24 = vadd.f32 %v2489_v49, %v2473_v10  ;;  %v2535_v26 = vld [vmem:[#allocation3 + $0x48] sm:$0xff] }
 0x186   : > { %v2252_v61 = vadd.f32 %v2236_v52, %v2220_v14  ;;  %v2321_v44 = vld [vmem:[#allocation3 + $0x68] sm:$0xff]  ;;  %v2558_v42 = vadd.f32 %v4437_v33, %v2535_v26  ;;  %v2456_v15 = vld [vmem:[#allocation2 + $0xe2] sm:$0xff] }
 0x187   : > { %v2337_v45 = vadd.f32 %v2321_v44, %v2305_v5  ;;  %2521 = vst.msk [vmem:[#allocation3 + $0x58] sm:$0xff] %vm1759_vm2, %v2505_v24  ;;  %v2477_v56 = vmul.f32 %v4667_v41, %v2456_v15  ;;  %v2783_v26 = vld [vmem:[%s4724_s28] sm:$0xff] }
 0x188   : > { %2268 = vst.msk [vmem:[#allocation3 + $0x70] sm:$0xff] %vm1759_vm2, %v2252_v61  ;;  %v2574_v51 = vmax.f32 %v2558_v42, 0.0  ;;  %v2785_v42 = vld [vmem:[%s4724_s28 + $0x10] sm:$0xff] }
 0x189   : > { %2353 = vst.msk [vmem:[#allocation3 + $0x68] sm:$0xff] %vm1759_vm2, %v2337_v45  ;;  %v2784_v45 = vld [vmem:[%s4724_s28 + $0x8] sm:$0xff] }
 0x18a   : > { %3383 = vmatmul.mubr.msk.f32.gmra.mxu1 %vm1759_vm2, %v2574_v51  ;;  %v2787_v51 = vld [vmem:[%s4724_s28 + $0x20] sm:$0xff] }
 0x18b   : > { %v2405_v27 = vld [vmem:[#allocation3 + $0x60] sm:$0xff]  ;;  %v2536_v22 = vld [vmem:[#allocation3 + $0x50] sm:$0xff] }
 0x18c   : > { %v2237_v1 = vld [vmem:[#allocation3 + $0x78] sm:$0xff]  ;;  %v2421_v18 = vadd.f32 %v2405_v27, %v2389_v38  ;;  %v2559_v47 = vadd.f32 %v4437_v33, %v2536_v22  ;;  %v2791_v38 = vld [vmem:[%s4724_s28 + $0x40] sm:$0xff]  ;;  %v2793_v27 = vld [vmem:[%s4724_s28 + $0x50] sm:$0xff] }
 0x18d   : > { %v2253_v60 = vadd.f32 %v2237_v1, %v2221_v8  ;;  %v2792_v8 = vld [vmem:[%s4724_s28 + $0x48] sm:$0xff]  ;;  %v2794_v22 = vld [vmem:[%s4724_s28 + $0x58] sm:$0xff]  ;;  %v2795_v1 = vld [vmem:[%s4724_s28 + $0x60] sm:$0xff] }
 0x18e   : > { %2437 = vst.msk [vmem:[#allocation3 + $0x60] sm:$0xff] %vm1759_vm2, %v2421_v18  ;;  %v2575_v9 = vmax.f32 %v2559_v47, 0.0  ;;  %v2537_v34 = vld [vmem:[#allocation3 + $0x58] sm:$0xff]  ;;  %v2797_v47 = vld [vmem:[%s4724_s28 + $0x70] sm:$0xff] }
 0x18f   : > { %v2322_v30 = vld [vmem:[#allocation3 + $0x70] sm:$0xff]  ;;  %2269 = vst.msk [vmem:[#allocation3 + $0x78] sm:$0xff] %vm1759_vm2, %v2253_v60  ;;  %v2560_v16 = vadd.f32 %v4437_v33, %v2537_v34  ;;  %v2796_v18 = vld [vmem:[%s4724_s28 + $0x68] sm:$0xff] }
 0x190   : > { %v2338_v29 = vadd.f32 %v2322_v30, %v2306_v13  ;;  %v2406_v58 = vld [vmem:[#allocation3 + $0x68] sm:$0xff]  ;;  %3385 = vmatprep.mubr.msk.f32.mxu1 %vm1759_vm2, %v2575_v9 }
 0x191   : > { %v2422_v4 = vadd.f32 %v2406_v58, %v2390_v17  ;;  %v2576_v7 = vmax.f32 %v2560_v16, 0.0  ;;  %v2798_v13 = vld [vmem:[%s4724_s28 + $0x78] sm:$0xff] }
 0x192   : > { %2354 = vst.msk [vmem:[#allocation3 + $0x70] sm:$0xff] %vm1759_vm2, %v2338_v29 }
 0x193   : > { %2438 = vst.msk [vmem:[#allocation3 + $0x68] sm:$0xff] %vm1759_vm2, %v2422_v4  ;;  %3386 = vmatmul.mubr.msk.f32.gmra.mxu1 %vm1759_vm2, %v2576_v7 }
 0x195   : > { %v2490_v2 = vld [vmem:[#allocation3 + $0x60] sm:$0xff] }
 0x196   : > { %v2506_v19 = vadd.f32 %v2490_v2, %v2474_v59  ;;  %v2323_v62 = vld [vmem:[#allocation3 + $0x78] sm:$0xff]  ;;  %v4765_v2 = vld [vmem:[%s4872_s7] ss:$0 sm:$0xff] }
 0x197   : > { %v2339_v63 = vadd.f32 %v2323_v62, %v2307_v11 }
 0x198   : > { %2522 = vst.msk [vmem:[#allocation3 + $0x60] sm:$0xff] %vm1759_vm2, %v2506_v19 }
 0x199   : > { %v2407_v21 = vld [vmem:[#allocation3 + $0x70] sm:$0xff]  ;;  %2355 = vst.msk [vmem:[#allocation3 + $0x78] sm:$0xff] %vm1759_vm2, %v2339_v63 }
 0x19a   : > { %v2423_v28 = vadd.f32 %v2407_v21, %v2391_v53  ;;  %v2491_v0 = vld [vmem:[#allocation3 + $0x68] sm:$0xff]  ;;  %v4775_v21 = vld [vmem:[%s4874_s9] ss:$0 sm:$0xff] }
 0x19b   : > { %v2507_v39 = vadd.f32 %v2491_v0, %v2475_v37 }
 0x19c   : > { %2439 = vst.msk [vmem:[#allocation3 + $0x70] sm:$0xff] %vm1759_vm2, %v2423_v28 }
 0x19d   : > { %2523 = vst.msk [vmem:[#allocation3 + $0x68] sm:$0xff] %vm1759_vm2, %v2507_v39 }
 0x19f   : > { %v2538_v50 = vld [vmem:[#allocation3 + $0x60] sm:$0xff] }
 0x1a0   : > { %v2561_v46 = vadd.f32 %v4437_v33, %v2538_v50  ;;  %v2408_v54 = vld [vmem:[#allocation3 + $0x78] sm:$0xff] }
 0x1a1   : > { %v2424_v35 = vadd.f32 %v2408_v54, %v2392_v40 }
 0x1a2   : > { %v2577_v57 = vmax.f32 %v2561_v46, 0.0 }
 0x1a3   : > { %v2492_v12 = vld [vmem:[#allocation3 + $0x70] sm:$0xff]  ;;  %2440 = vst.msk [vmem:[#allocation3 + $0x78] sm:$0xff] %vm1759_vm2, %v2424_v35 }
 0x1a4   : > { %v2508_v36 = vadd.f32 %v2492_v12, %v2476_v55  ;;  %3388 = vmatprep.mubr.msk.f32.mxu1 %vm1759_vm2, %v2577_v57  ;;  %v2539_v3 = vld [vmem:[#allocation3 + $0x68] sm:$0xff] }
 0x1a5   : > { %v2562_v43 = vadd.f32 %v4437_v33, %v2539_v3 }
 0x1a6   : > { %2524 = vst.msk [vmem:[#allocation3 + $0x70] sm:$0xff] %vm1759_vm2, %v2508_v36 }
 0x1a7   : > { %v2578_v10 = vmax.f32 %v2562_v43, 0.0 }
 0x1a9   : > { %3389 = vmatmul.mubr.msk.f32.gmra.mxu1 %vm1759_vm2, %v2578_v10 }
 0x1aa   : > { %v2493_v14 = vld [vmem:[#allocation3 + $0x78] sm:$0xff] }
 0x1ab   : > { %v2509_v52 = vadd.f32 %v2493_v14, %v2477_v56 }
 0x1ad   : > { %v2540_v49 = vld [vmem:[#allocation3 + $0x70] sm:$0xff]  ;;  %2525 = vst.msk [vmem:[#allocation3 + $0x78] sm:$0xff] %vm1759_vm2, %v2509_v52 }
 0x1ae   : > { %v2563_v61 = vadd.f32 %v4437_v33, %v2540_v49 }
 0x1b0   : > { %v2579_v5 = vmax.f32 %v2563_v61, 0.0 }
 0x1b2   : > { %3391 = vmatprep.mubr.msk.f32.mxu1 %vm1759_vm2, %v2579_v5 }
 0x1b4   : > { %v2541_v41 = vld [vmem:[#allocation3 + $0x78] sm:$0xff] }
 0x1b5   : > { %v2564_v24 = vadd.f32 %v4437_v33, %v2541_v41  ;;  %v2788_v33 = vld [vmem:[%s4724_s28 + $0x28] sm:$0xff] }
 0x1b7   : > { %v2580_v44 = vmax.f32 %v2564_v24, 0.0 }
 0x1b9   : > { %3392 = vmatmul.mubr.msk.f32.gmra.mxu1 %vm1759_vm2, %v2580_v44 }
 0x1ba   : > { %3396 = vmatprep.mubr.msk.f32.mxu1 %vm479_vm1, %v2783_v26 }
 0x1bd   : > { %3397 = vmatmul.mubr.msk.f32.vlgmr.msra.gmra.mxu1 %vm479_vm1, %v2784_v45 }
 0x1be   : > { %3399 = vmatprep.mubr.msk.f32.mxu1 %vm479_vm1, %v2785_v42 }
 0x1c1   : > { %3400 = vmatmul.mubr.msk.f32.gmra.mxu1 %vm479_vm1, %v2786_v23 }
 0x1c2   : > { %3402 = vmatprep.mubr.msk.f32.mxu1 %vm479_vm1, %v2787_v51 }
 0x1c5   : > { %3403 = vmatmul.mubr.msk.f32.gmra.mxu1 %vm479_vm1, %v2788_v33 }
 0x1c6   : > { %3405 = vmatprep.mubr.msk.f32.mxu1 %vm479_vm1, %v2789_v25 }
 0x1c9   : > { %3406 = vmatmul.mubr.msk.f32.gmra.mxu1 %vm479_vm1, %v2790_v20 }
 0x1ca   : > { %3408 = vmatprep.mubr.msk.f32.mxu1 %vm479_vm1, %v2791_v38 }
 0x1cd   : > { %3409 = vmatmul.mubr.msk.f32.gmra.mxu1 %vm479_vm1, %v2792_v8 }
 0x1ce   : > { %3411 = vmatprep.mubr.msk.f32.mxu1 %vm479_vm1, %v2793_v27 }
 0x1d1   : > { %3412 = vmatmul.mubr.msk.f32.gmra.mxu1 %vm479_vm1, %v2794_v22 }
 0x1d2   : > { %3414 = vmatprep.mubr.msk.f32.mxu1 %vm479_vm1, %v2795_v1 }
 0x1d5   : > { %3415 = vmatmul.mubr.msk.f32.gmra.mxu1 %vm479_vm1, %v2796_v18 }
 0x1d6   : > { %3417 = vmatprep.mubr.msk.f32.mxu1 %vm479_vm1, %v2797_v47 }
 0x1d9   : > { %3418 = vmatmul.mubr.msk.f32.gmra.mxu1 %vm479_vm1, %v2798_v13 }
 0x217   : > { %v3372_v60 = vpop.f32.mrf.mxu1 }
 0x218   : > { %v2710_v53 = vadd.f32 %v3372_v60, %v4765_v2 }
 0x219   : > { %v2704_v9 = vpop.f32.mrf.mxu1 }
 0x21a   : > { %v2705_v37 = vadd.f32 %v4765_v2, %v2704_v9 }
 0x222   : > { %v3375_v34 = vpop.f32.mrf.mxu1 }
 0x223   : > { %v2720_v39 = vadd.f32 %v3375_v34, %v4765_v2 }
 0x224   : > { %v2714_v30 = vpop.f32.mrf.mxu1 }
 0x225   : > { %v2715_v50 = vadd.f32 %v4765_v2, %v2714_v30 }
 0x227   : > { %v3378_v17 = vpop.f32.mrf.mxu1 }
 0x228   : > { %v2730_v35 = vadd.f32 %v3378_v17, %v4765_v2 }
 0x229   : > { %v2724_v16 = vpop.f32.mrf.mxu1 }
 0x22a   : > { %v2725_v3 = vadd.f32 %v4765_v2, %v2724_v16 }
 0x237   : > { %v3381_v29 = vpop.f32.mrf.mxu1 }
 0x238   : > { %v2740_v56 = vadd.f32 %v3381_v29, %v4765_v2 }
 0x239   : > { %v2734_v58 = vpop.f32.mrf.mxu1 }
 0x23a   : > { %v2735_v61 = vadd.f32 %v4765_v2, %v2734_v58 }
 0x24a   : > { %v3384_v4 = vpop.f32.mrf.mxu1 }
 0x24b   : > { %v2750_v44 = vadd.f32 %v3384_v4, %v4765_v2 }
 0x24c   : > { %v2744_v7 = vpop.f32.mrf.mxu1 }
 0x24d   : > { %v2745_v23 = vadd.f32 %v4765_v2, %v2744_v7 }
 0x253   : > { %v3387_v6 = vpop.f32.mrf.mxu1 }
 0x254   : > { %v2760_v20 = vadd.f32 %v3387_v6, %v4765_v2 }
 0x255   : > { %v2754_v32 = vpop.f32.mrf.mxu1 }
 0x256   : > { %v2755_v22 = vadd.f32 %v4765_v2, %v2754_v32 }
 0x269   : > { %v3390_v59 = vpop.f32.mrf.mxu1 }
 0x26a   : > { %v2770_v13 = vadd.f32 %v3390_v59, %v4765_v2 }
 0x26b   : > { %v4760_v11 = vpop.f32.mrf.mxu1 }
 0x26c   : > { %v2765_v30 = vadd.f32 %v4765_v2, %v4760_v11 }
 0x279   : > { %v4767_v19 = vpop.f32.mrf.mxu1 }
 0x27a   : > { %v2780_v58 = vadd.f32 %v4767_v19, %v4765_v2 }
 0x27b   : > { %v4769_v62 = vpop.f32.mrf.mxu1 }
 0x27c   : > { %v2775_v32 = vadd.f32 %v4765_v2, %v4769_v62 }
 0x27d   : > { %v3398_v63 = vpop.f32.mrf.mxu1 }
 0x27e   : > { %v2994_v28 = vadd.f32 %v3398_v63, %v2710_v53 }
 0x27f   : > { %v2914_v0 = vpop.f32.mrf.mxu1 }
 0x280   : > { %v3017_v48 = vadd.f32 %v4775_v21, %v2994_v28  ;;  %v2993_v31 = vadd.f32 %v2914_v0, %v2705_v37 }
 0x281   : > { %v3401_v40 = vpop.f32.mrf.mxu1 }
 0x282   : > { %3033 = vst.msk [vmem:[%s4783_s15 + $0x8] sm:$0xff] %vm1759_vm2, %v3017_v48  ;;  %v3016_v46 = vadd.f32 %v4775_v21, %v2993_v31  ;;  %v2996_v54 = vadd.f32 %v3401_v40, %v2720_v39 }
 0x283   : > { %v2924_v55 = vpop.f32.mrf.mxu1 }
 0x284   : > { %3032 = vst.msk [vmem:[%s4783_s15] sm:$0xff] %vm1759_vm2, %v3016_v46  ;;  %v3019_v57 = vadd.f32 %v4775_v21, %v2996_v54  ;;  %v2995_v12 = vadd.f32 %v2924_v55, %v2715_v50 }
 0x285   : > { %v3404_v36 = vpop.f32.mrf.mxu1 }
 0x286   : > { %3035 = vst.msk [vmem:[%s4783_s15 + $0x18] sm:$0xff] %vm1759_vm2, %v3019_v57  ;;  %v3018_v43 = vadd.f32 %v4775_v21, %v2995_v12  ;;  %v2998_v15 = vadd.f32 %v3404_v36, %v2730_v35 }
 0x287   : > { %v2934_v10 = vpop.f32.mrf.mxu1 }
 0x288   : > { %3034 = vst.msk [vmem:[%s4783_s15 + $0x10] sm:$0xff] %vm1759_vm2, %v3018_v43  ;;  %v3021_v14 = vadd.f32 %v4775_v21, %v2998_v15  ;;  %v2997_v52 = vadd.f32 %v2934_v10, %v2725_v3 }
 0x289   : > { %v3407_v49 = vpop.f32.mrf.mxu1 }
 0x28a   : > { %3037 = vst.msk [vmem:[%s4783_s15 + $0x28] sm:$0xff] %vm1759_vm2, %v3021_v14  ;;  %v3020_v5 = vadd.f32 %v4775_v21, %v2997_v52  ;;  %v3000_v41 = vadd.f32 %v3407_v49, %v2740_v56 }
 0x28b   : > { %v2944_v24 = vpop.f32.mrf.mxu1 }
 0x28c   : > { %3036 = vst.msk [vmem:[%s4783_s15 + $0x20] sm:$0xff] %vm1759_vm2, %v3020_v5  ;;  %v3023_v26 = vadd.f32 %v4775_v21, %v3000_v41  ;;  %v2999_v45 = vadd.f32 %v2944_v24, %v2735_v61 }
 0x28d   : > { %v3410_v42 = vpop.f32.mrf.mxu1 }
 0x28e   : > { %3039 = vst.msk [vmem:[%s4783_s15 + $0x38] sm:$0xff] %vm1759_vm2, %v3023_v26  ;;  %v3022_v51 = vadd.f32 %v4775_v21, %v2999_v45  ;;  %v3002_v33 = vadd.f32 %v3410_v42, %v2750_v44 }
 0x28f   : > { %v2954_v25 = vpop.f32.mrf.mxu1 }
 0x290   : > { %3038 = vst.msk [vmem:[%s4783_s15 + $0x30] sm:$0xff] %vm1759_vm2, %v3022_v51  ;;  %v3025_v38 = vadd.f32 %v4775_v21, %v3002_v33  ;;  %v3001_v8 = vadd.f32 %v2954_v25, %v2745_v23 }
 0x291   : > { %v3413_v27 = vpop.f32.mrf.mxu1 }
 0x292   : > { %3041 = vst.msk [vmem:[%s4783_s15 + $0x48] sm:$0xff] %vm1759_vm2, %v3025_v38  ;;  %v3024_v1 = vadd.f32 %v4775_v21, %v3001_v8  ;;  %v3004_v18 = vadd.f32 %v3413_v27, %v2760_v20 }
 0x293   : > { %v2964_v47 = vpop.f32.mrf.mxu1 }
 0x294   : > { %3040 = vst.msk [vmem:[%s4783_s15 + $0x40] sm:$0xff] %vm1759_vm2, %v3024_v1  ;;  %v3027_v60 = vadd.f32 %v4775_v21, %v3004_v18  ;;  %v3003_v9 = vadd.f32 %v2964_v47, %v2755_v22 }
 0x295   : > { %v3416_v34 = vpop.f32.mrf.mxu1 }
 0x296   : > { %3043 = vst.msk [vmem:[%s4783_s15 + $0x58] sm:$0xff] %vm1759_vm2, %v3027_v60  ;;  %v3026_v17 = vadd.f32 %v4775_v21, %v3003_v9  ;;  %v3006_v16 = vadd.f32 %v3416_v34, %v2770_v13 }
 0x297   : > { %v2974_v29 = vpop.f32.mrf.mxu1 }
 0x298   : > { %3042 = vst.msk [vmem:[%s4783_s15 + $0x50] sm:$0xff] %vm1759_vm2, %v3026_v17  ;;  %v3029_v4 = vadd.f32 %v4775_v21, %v3006_v16  ;;  %v3005_v7 = vadd.f32 %v2974_v29, %v2765_v30 }
 0x299   : > { %v3419_v6 = vpop.f32.mrf.mxu1 }
 0x29a   : > { %3045 = vst.msk [vmem:[%s4783_s15 + $0x68] sm:$0xff] %vm1759_vm2, %v3029_v4  ;;  %v3028_v59 = vadd.f32 %v4775_v21, %v3005_v7  ;;  %v3008_v11 = vadd.f32 %v3419_v6, %v2780_v58 }
 0x29b   : > { %v2984_v53 = vpop.f32.mrf.mxu1 }
 0x29c   : > { %3044 = vst.msk [vmem:[%s4783_s15 + $0x60] sm:$0xff] %vm1759_vm2, %v3028_v59  ;;  %v3031_v63 = vadd.f32 %v4775_v21, %v3008_v11  ;;  %v3007_v19 = vadd.f32 %v2984_v53, %v2775_v32 }
 0x29e   : > { %3047 = vst.msk [vmem:[%s4783_s15 + $0x78] sm:$0xff] %vm1759_vm2, %v3031_v63  ;;  %v3030_v37 = vadd.f32 %v4775_v21, %v3007_v19 }
 0x2a0   : > { %3046 = vst.msk [vmem:[%s4783_s15 + $0x70] sm:$0xff] %vm1759_vm2, %v3030_v37 }
 0x2a1 PF: > { %s21_s21 = sadd.s32 1, %s3517_s21   ;;  %s4877_s17 = smov %s3509_s19 }
 0x2a2   : > { %p18_p7 = scmp.ge.s32.totalorder %s21_s21, 6   ;;  %s4878_s18 = smov %s3513_s20 }
 0x2a3   : > { %s4879_s19 = smov %s4882_s22  ;;  %s4880_s20 = smov %s4886_s23 }
 0x2a4   :  { %20 = sbr.rel (!%p18_p7) target bundleno = 3 (0x3), region = 101 }

</bundles_post_ra>
